<compile_context>
chip_gen: v5e
topology: v5e:2x2
jax: 0.10.0
libtpu: 0.0.40
codegen_flags: <defaults>
</compile_context>

<pallas_src>
import jax
import jax.numpy as jnp
from jax import lax
from jax.experimental import pallas as pl
from jax.experimental.pallas import tpu as pltpu

# ---- static configuration (small shapes) ----
B, S = 2, 8            # batch, sequence
D_IN = 16              # input feature dim
D_MODEL = 32
NHEAD = 4
DH = D_MODEL // NHEAD  # 8
NUM_ENC = 2
D_FEED = 64
NUM_CLS = 10
OUT_PAD = 128          # lane-dense output width (sliced back to NUM_CLS in the wrapper)
EPS = 1e-5             # LayerNorm and BatchNorm eps defaults
LANES = 128

# ---- single parameter slab layout (rows x 128 lanes), bf16, all offsets static ----
# top-level region
R_WEXT = 0             # (D_IN, D_MODEL)        input_extend weight^T, lanes 0:32
R_FCW = 16             # (D_MODEL, OUT_PAD)     classifier weight^T, zero-padded to 128 lanes
R_BEXT = 48            # (1, D_MODEL)
R_LNFG = 49            # (1, D_MODEL)           final encoder LayerNorm gamma
R_LNFB = 50            # (1, D_MODEL)
R_FCB = 51             # (1, OUT_PAD)           classifier bias, zero-padded
R_BNG = 56             # (S, D_MODEL)           BN gamma, pre-broadcast over feature dim
R_BNB = 64             # (S, D_MODEL)           BN beta,  pre-broadcast over feature dim
TOP_ROWS = 80

# per-layer region (lane-packed)
L_W = 0                # rows [0:32): lanes 0:96 = in_proj_weight^T (Wq|Wk|Wv), lanes 96:128 = out_proj_weight^T
L_FF = 32              # rows [32:96): lanes 0:32 = ff2_weight^T (64x32); rows [32:64) lanes 32:96 = ff1_weight^T (32x64)
LV_BQKV = 96           # (1, 96)  in_proj_bias
LV_BO = 97             # (1, 32)  out_proj bias
LV_LN1G = 98
LV_LN1B = 99
LV_LN2G = 100
LV_LN2B = 101
LV_FF1B = 102          # (1, 64)
LV_FF2B = 103          # (1, 32)
LAYER_ROWS = 112
MAT_ROWS = TOP_ROWS + NUM_ENC * LAYER_ROWS   # 304 rows -> ~78 KB in bf16


def _sigmoid(x):
    # sigmoid(x) = 0.5 * tanh(x/2) + 0.5  -> one EUP op instead of exp + reciprocal
    return 0.5 * jnp.tanh(0.5 * x) + 0.5


def _layernorm(x, g, b):
    mu = jnp.mean(x, axis=-1, keepdims=True)
    d = x - mu
    var = jnp.mean(d * d, axis=-1, keepdims=True)
    return d * lax.rsqrt(var + EPS) * g + b


def transformer_kernel(x_ref, p_ref, o_ref):
    f32 = jnp.float32
    scale = 1.0 / (DH ** 0.5)

    def vrow(r, n):  # one parameter vector row, lanes [0:n)
        return p_ref[r:r + 1, 0:n].astype(f32)

    x = x_ref[...].astype(f32).reshape(B * S, D_IN)

    # ---- input_extend: Linear(d_in -> d_model) ----
    w_ext = p_ref[R_WEXT:R_WEXT + D_IN, 0:D_MODEL].astype(f32)
    h = jnp.dot(x, w_ext, preferred_element_type=f32) + vrow(R_BEXT, D_MODEL)   # (B*S, D)

    # ---- BatchNorm1d over channel dim = seq (training-mode batch stats), then sigmoid ----
    h3 = h.reshape(B, S, D_MODEL)
    s1 = jnp.sum(jnp.sum(h3, axis=2, keepdims=True), axis=0, keepdims=True)        # (1,S,1)
    s2 = jnp.sum(jnp.sum(h3 * h3, axis=2, keepdims=True), axis=0, keepdims=True)   # (1,S,1)
    n = float(B * D_MODEL)
    mean = s1 / n
    var = s2 / n - mean * mean                                   # biased variance (training BN)
    inv = lax.rsqrt(var + EPS)
    bn_g = p_ref[R_BNG:R_BNG + S, 0:D_MODEL].astype(f32).reshape(1, S, D_MODEL)
    bn_b = p_ref[R_BNB:R_BNB + S, 0:D_MODEL].astype(f32).reshape(1, S, D_MODEL)
    h3 = _sigmoid((h3 - mean) * (inv * bn_g) + bn_b)
    h2 = h3.reshape(B * S, D_MODEL)

    # ---- TransformerEncoder layers (post-LN, relu activation, dropout=0) ----
    for l in range(NUM_ENC):
        mb = TOP_ROWS + l * LAYER_ROWS

        wblk = p_ref[mb + L_W:mb + L_W + D_MODEL, :].astype(f32)         # (32, 128)
        wqkv = wblk[:, 0:3 * D_MODEL]                                    # (32, 96)  = [Wq^T | Wk^T | Wv^T]
        wo = wblk[:, 3 * D_MODEL:4 * D_MODEL]                            # (32, 32)  = out_proj.weight^T
        fblk = p_ref[mb + L_FF:mb + L_FF + D_FEED, :].astype(f32)        # (64, 128)
        ff2w = fblk[:, 0:D_MODEL]                                        # (64, 32)
        ff1w = fblk[0:D_MODEL, D_MODEL:D_MODEL + D_FEED]                 # (32, 64)

        # fused QKV projection: one (16,32)x(32,96) matmul + full in_proj bias
        qkv = jnp.dot(h2, wqkv, preferred_element_type=f32) + vrow(mb + LV_BQKV, 3 * D_MODEL)  # (B*S, 96)

        def split_heads(base):
            # lanes [base : base+D_MODEL) of qkv -> (NHEAD*B, S, DH), batch order = (head, b)
            return jnp.concatenate(
                [qkv[:, base + hh * DH: base + (hh + 1) * DH].reshape(B, S, DH)
                 for hh in range(NHEAD)], axis=0)

        qh = split_heads(0)
        kh = split_heads(D_MODEL)
        vh = split_heads(2 * D_MODEL)

        scores = lax.dot_general(qh, kh, (((2,), (2,)), ((0,), (0,))),
                                 preferred_element_type=f32) * scale      # (NHEAD*B, S, S)
        m = jnp.max(scores, axis=-1, keepdims=True)
        e = jnp.exp(scores - m)
        p = e / jnp.sum(e, axis=-1, keepdims=True)                        # exact softmax normalization
        ctx = lax.dot_general(p, vh, (((2,), (1,)), ((0,), (0,))),
                              preferred_element_type=f32)                 # (NHEAD*B, S, DH)

        # fused out-projection: lane-concat heads back to (B*S, D_MODEL), one matmul against Wo^T
        ctx2 = jnp.concatenate(
            [ctx[hh * B:(hh + 1) * B].reshape(B * S, DH) for hh in range(NHEAD)], axis=1)
        attn = jnp.dot(ctx2, wo, preferred_element_type=f32) + vrow(mb + LV_BO, D_MODEL)

        h2 = _layernorm(h2 + attn,
                        vrow(mb + LV_LN1G, D_MODEL), vrow(mb + LV_LN1B, D_MODEL))

        ff = jnp.dot(h2, ff1w, preferred_element_type=f32) + vrow(mb + LV_FF1B, D_FEED)
        ff = jnp.maximum(ff, 0.0)                                         # relu activation
        ff = jnp.dot(ff, ff2w, preferred_element_type=f32) + vrow(mb + LV_FF2B, D_MODEL)
        h2 = _layernorm(h2 + ff,
                        vrow(mb + LV_LN2G, D_MODEL), vrow(mb + LV_LN2B, D_MODEL))

    # ---- final encoder LayerNorm, sigmoid, classifier (lane-dense padded output) ----
    h2 = _layernorm(h2, vrow(R_LNFG, D_MODEL), vrow(R_LNFB, D_MODEL))
    y = _sigmoid(h2)
    fc_w = p_ref[R_FCW:R_FCW + D_MODEL, :].astype(f32)                    # (32, 128)
    fc_b = p_ref[R_FCB:R_FCB + 1, :].astype(f32)                          # (1, 128)
    o_ref[...] = jnp.dot(y, fc_w, preferred_element_type=f32) + fc_b


def init_params(key):
    """Deterministic synthetic parameters in PyTorch layouts, packed into one lane-dense bf16 slab."""
    L = NUM_ENC
    keys = jax.random.split(key, 12)

    def nrm(k, shape):
        return (0.1 * jax.random.normal(k, shape)).astype(jnp.float32)

    # PyTorch-shaped parameters (Linear weight = (out, in))
    w_ext = nrm(keys[0], (D_MODEL, D_IN))
    b_ext = nrm(keys[1], (D_MODEL,))
    bn_g = jnp.ones((S,), jnp.float32)
    bn_b = jnp.zeros((S,), jnp.float32)
    in_proj_w = nrm(keys[2], (L, 3 * D_MODEL, D_MODEL))
    in_proj_b = nrm(keys[3], (L, 3 * D_MODEL))
    out_proj_w = nrm(keys[4], (L, D_MODEL, D_MODEL))
    out_proj_b = nrm(keys[5], (L, D_MODEL))
    ln1_g = jnp.ones((L, D_MODEL), jnp.float32)
    ln1_b = jnp.zeros((L, D_MODEL), jnp.float32)
    ln2_g = jnp.ones((L, D_MODEL), jnp.float32)
    ln2_b = jnp.zeros((L, D_MODEL), jnp.float32)
    ff1_w = nrm(keys[6], (L, D_FEED, D_MODEL))
    ff1_b = nrm(keys[7], (L, D_FEED))
    ff2_w = nrm(keys[8], (L, D_MODEL, D_FEED))
    ff2_b = nrm(keys[9], (L, D_MODEL))
    lnf_g = jnp.ones((D_MODEL,), jnp.float32)
    lnf_b = jnp.zeros((D_MODEL,), jnp.float32)
    fc_w = nrm(keys[10], (NUM_CLS, D_MODEL))
    fc_b = nrm(keys[11], (NUM_CLS,))

    p = jnp.zeros((MAT_ROWS, LANES), jnp.float32)

    # ---- top-level params ----
    p = p.at[R_WEXT:R_WEXT + D_IN, 0:D_MODEL].set(w_ext.T)
    p = p.at[R_FCW:R_FCW + D_MODEL, 0:NUM_CLS].set(fc_w.T)       # lanes >= NUM_CLS stay zero
    p = p.at[R_BEXT, 0:D_MODEL].set(b_ext)
    p = p.at[R_LNFG, 0:D_MODEL].set(lnf_g)
    p = p.at[R_LNFB, 0:D_MODEL].set(lnf_b)
    p = p.at[R_FCB, 0:NUM_CLS].set(fc_b)
    p = p.at[R_BNG:R_BNG + S, 0:D_MODEL].set(jnp.broadcast_to(bn_g[:, None], (S, D_MODEL)))
    p = p.at[R_BNB:R_BNB + S, 0:D_MODEL].set(jnp.broadcast_to(bn_b[:, None], (S, D_MODEL)))

    # ---- per-layer params (lane-packed) ----
    for l in range(L):
        mb = TOP_ROWS + l * LAYER_ROWS
        # rows [0:32): lanes 0:96 = in_proj_weight^T, lanes 96:128 = out_proj_weight^T
        p = p.at[mb + L_W:mb + L_W + D_MODEL, 0:3 * D_MODEL].set(in_proj_w[l].T)
        p = p.at[mb + L_W:mb + L_W + D_MODEL, 3 * D_MODEL:4 * D_MODEL].set(out_proj_w[l].T)
        # rows [32:96): lanes 0:32 = ff2^T (64x32); rows [32:64) lanes 32:96 = ff1^T (32x64)
        p = p.at[mb + L_FF:mb + L_FF + D_FEED, 0:D_MODEL].set(ff2_w[l].T)
        p = p.at[mb + L_FF:mb + L_FF + D_MODEL, D_MODEL:D_MODEL + D_FEED].set(ff1_w[l].T)
        # vector rows
        p = p.at[mb + LV_BQKV, 0:3 * D_MODEL].set(in_proj_b[l])
        p = p.at[mb + LV_BO, 0:D_MODEL].set(out_proj_b[l])
        p = p.at[mb + LV_LN1G, 0:D_MODEL].set(ln1_g[l])
        p = p.at[mb + LV_LN1B, 0:D_MODEL].set(ln1_b[l])
        p = p.at[mb + LV_LN2G, 0:D_MODEL].set(ln2_g[l])
        p = p.at[mb + LV_LN2B, 0:D_MODEL].set(ln2_b[l])
        p = p.at[mb + LV_FF1B, 0:D_FEED].set(ff1_b[l])
        p = p.at[mb + LV_FF2B, 0:D_MODEL].set(ff2_b[l])

    return p.astype(jnp.bfloat16)


@jax.jit
def transformer_forward(x, params):
    out = pl.pallas_call(
        transformer_kernel,
        out_shape=jax.ShapeDtypeStruct((B * S, OUT_PAD), jnp.float32),
        in_specs=[pl.BlockSpec(memory_space=pltpu.MemorySpace.VMEM)] * 2,
        out_specs=pl.BlockSpec(memory_space=pltpu.MemorySpace.VMEM),
    )(x, params)
    return out[:, :NUM_CLS].reshape(B, S, NUM_CLS)


if __name__ == "__main__":
    key = jax.random.PRNGKey(0)
    kx, kp = jax.random.split(key)
    x = jax.random.normal(kx, (B, S, D_IN), dtype=jnp.float32)
    params = init_params(kp)
    y = transformer_forward(x, params)
    jax.block_until_ready(y)
    assert y.shape == (B, S, NUM_CLS)
    assert bool(jnp.all(jnp.isfinite(y)))
    print("KERNEL_OK")
</pallas_src>

<mosaic_0001>
module attributes {stable_mosaic.version = 11 : i64} {
  func.func @transformer_kernel(%arg0: memref<2x8x16xf32, #tpu.memory_space<vmem>>, %arg1: memref<304x128xbf16, #tpu.memory_space<vmem>>, %arg2: memref<16x128xf32, #tpu.memory_space<vmem>>) attributes {dimension_semantics = [], scalar_prefetch = 0 : i64, scratch_operands = 0 : i64, tpu.core_type = #tpu.core_type<tc>} {
    %c0 = arith.constant 0 : index
    %c0_0 = arith.constant 0 : index
    %c0_1 = arith.constant 0 : index
    %0 = vector.load %arg0[%c0, %c0_0, %c0_1] : memref<2x8x16xf32, #tpu.memory_space<vmem>>, vector<2x8x16xf32>
    %1 = vector.shape_cast %0 : vector<2x8x16xf32> to vector<16x16xf32>
    %c0_2 = arith.constant 0 : index
    %c0_3 = arith.constant 0 : index
    %2 = vector.load %arg1[%c0_2, %c0_3] : memref<304x128xbf16, #tpu.memory_space<vmem>>, vector<16x32xbf16>
    %3 = arith.extf %2 : vector<16x32xbf16> to vector<16x32xf32>
    %cst = arith.constant dense<0.000000e+00> : vector<16x32xf32>
    %4 = tpu.matmul %1, %3, %cst {dimension_numbers = #tpu.dot_dimension_numbers<[1], [0], [0], [1], [0, 0, 1, 1], [], []>} : vector<16x16xf32>, vector<16x32xf32>, vector<16x32xf32> -> vector<16x32xf32>
    %c48 = arith.constant 48 : index
    %c0_4 = arith.constant 0 : index
    %5 = vector.load %arg1[%c48, %c0_4] : memref<304x128xbf16, #tpu.memory_space<vmem>>, vector<1x32xbf16>
    %6 = arith.extf %5 : vector<1x32xbf16> to vector<1x32xf32>
    %7 = vector.broadcast %6 : vector<1x32xf32> to vector<16x32xf32>
    %8 = arith.addf %4, %7 : vector<16x32xf32>
    %9 = vector.shape_cast %8 : vector<16x32xf32> to vector<2x8x32xf32>
    %cst_5 = arith.constant dense<0.000000e+00> : vector<2x8xf32>
    %10 = vector.multi_reduction <add>, %9, %cst_5 [2] : vector<2x8x32xf32> to vector<2x8xf32>
    %11 = vector.shape_cast %10 : vector<2x8xf32> to vector<2x8x1xf32>
    %cst_6 = arith.constant dense<0.000000e+00> : vector<8x1xf32>
    %12 = vector.multi_reduction <add>, %11, %cst_6 [0] : vector<2x8x1xf32> to vector<8x1xf32>
    %13 = vector.shape_cast %12 : vector<8x1xf32> to vector<1x8x1xf32>
    %14 = arith.mulf %9, %9 : vector<2x8x32xf32>
    %cst_7 = arith.constant dense<0.000000e+00> : vector<2x8xf32>
    %15 = vector.multi_reduction <add>, %14, %cst_7 [2] : vector<2x8x32xf32> to vector<2x8xf32>
    %16 = vector.shape_cast %15 : vector<2x8xf32> to vector<2x8x1xf32>
    %cst_8 = arith.constant dense<0.000000e+00> : vector<8x1xf32>
    %17 = vector.multi_reduction <add>, %16, %cst_8 [0] : vector<2x8x1xf32> to vector<8x1xf32>
    %18 = vector.shape_cast %17 : vector<8x1xf32> to vector<1x8x1xf32>
    %cst_9 = arith.constant 6.400000e+01 : f32
    %19 = vector.broadcast %cst_9 : f32 to vector<1x8x1xf32>
    %20 = arith.divf %13, %19 : vector<1x8x1xf32>
    %cst_10 = arith.constant 6.400000e+01 : f32
    %21 = vector.broadcast %cst_10 : f32 to vector<1x8x1xf32>
    %22 = arith.divf %18, %21 : vector<1x8x1xf32>
    %23 = arith.mulf %20, %20 : vector<1x8x1xf32>
    %24 = arith.subf %22, %23 : vector<1x8x1xf32>
    %cst_11 = arith.constant 9.99999974E-6 : f32
    %25 = vector.broadcast %cst_11 : f32 to vector<1x8x1xf32>
    %26 = arith.addf %24, %25 : vector<1x8x1xf32>
    %27 = math.rsqrt %26 : vector<1x8x1xf32>
    %c56 = arith.constant 56 : index
    %c0_12 = arith.constant 0 : index
    %28 = vector.load %arg1[%c56, %c0_12] : memref<304x128xbf16, #tpu.memory_space<vmem>>, vector<8x32xbf16>
    %29 = arith.extf %28 : vector<8x32xbf16> to vector<8x32xf32>
    %30 = vector.shape_cast %29 : vector<8x32xf32> to vector<1x8x32xf32>
    %c64 = arith.constant 64 : index
    %c0_13 = arith.constant 0 : index
    %31 = vector.load %arg1[%c64, %c0_13] : memref<304x128xbf16, #tpu.memory_space<vmem>>, vector<8x32xbf16>
    %32 = arith.extf %31 : vector<8x32xbf16> to vector<8x32xf32>
    %33 = vector.shape_cast %32 : vector<8x32xf32> to vector<1x8x32xf32>
    %34 = vector.broadcast %20 : vector<1x8x1xf32> to vector<2x8x32xf32>
    %35 = arith.subf %9, %34 : vector<2x8x32xf32>
    %36 = vector.broadcast %27 : vector<1x8x1xf32> to vector<1x8x32xf32>
    %37 = arith.mulf %36, %30 : vector<1x8x32xf32>
    %38 = vector.broadcast %37 : vector<1x8x32xf32> to vector<2x8x32xf32>
    %39 = arith.mulf %35, %38 : vector<2x8x32xf32>
    %40 = vector.broadcast %33 : vector<1x8x32xf32> to vector<2x8x32xf32>
    %41 = arith.addf %39, %40 : vector<2x8x32xf32>
    %cst_14 = arith.constant 5.000000e-01 : f32
    %42 = vector.broadcast %cst_14 : f32 to vector<2x8x32xf32>
    %43 = arith.mulf %42, %41 : vector<2x8x32xf32>
    %44 = math.tanh %43 : vector<2x8x32xf32>
    %cst_15 = arith.constant 5.000000e-01 : f32
    %45 = vector.broadcast %cst_15 : f32 to vector<2x8x32xf32>
    %46 = arith.mulf %45, %44 : vector<2x8x32xf32>
    %cst_16 = arith.constant 5.000000e-01 : f32
    %47 = vector.broadcast %cst_16 : f32 to vector<2x8x32xf32>
    %48 = arith.addf %46, %47 : vector<2x8x32xf32>
    %49 = vector.shape_cast %48 : vector<2x8x32xf32> to vector<16x32xf32>
    %c80 = arith.constant 80 : index
    %c0_17 = arith.constant 0 : index
    %50 = vector.load %arg1[%c80, %c0_17] : memref<304x128xbf16, #tpu.memory_space<vmem>>, vector<32x128xbf16>
    %51 = arith.extf %50 : vector<32x128xbf16> to vector<32x128xf32>
    %52 = vector.extract_strided_slice %51 {offsets = [0, 0], sizes = [32, 96], strides = [1, 1]} : vector<32x128xf32> to vector<32x96xf32>
    %53 = vector.extract_strided_slice %51 {offsets = [0, 96], sizes = [32, 32], strides = [1, 1]} : vector<32x128xf32> to vector<32x32xf32>
    %c112 = arith.constant 112 : index
    %c0_18 = arith.constant 0 : index
    %54 = vector.load %arg1[%c112, %c0_18] : memref<304x128xbf16, #tpu.memory_space<vmem>>, vector<64x128xbf16>
    %55 = arith.extf %54 : vector<64x128xbf16> to vector<64x128xf32>
    %56 = vector.extract_strided_slice %55 {offsets = [0, 0], sizes = [64, 32], strides = [1, 1]} : vector<64x128xf32> to vector<64x32xf32>
    %57 = vector.extract_strided_slice %55 {offsets = [0, 32], sizes = [32, 64], strides = [1, 1]} : vector<64x128xf32> to vector<32x64xf32>
    %cst_19 = arith.constant dense<0.000000e+00> : vector<16x96xf32>
    %58 = tpu.matmul %49, %52, %cst_19 {dimension_numbers = #tpu.dot_dimension_numbers<[1], [0], [0], [1], [0, 0, 1, 1], [], []>} : vector<16x32xf32>, vector<32x96xf32>, vector<16x96xf32> -> vector<16x96xf32>
    %c176 = arith.constant 176 : index
    %c0_20 = arith.constant 0 : index
    %59 = vector.load %arg1[%c176, %c0_20] : memref<304x128xbf16, #tpu.memory_space<vmem>>, vector<1x96xbf16>
    %60 = arith.extf %59 : vector<1x96xbf16> to vector<1x96xf32>
    %61 = vector.broadcast %60 : vector<1x96xf32> to vector<16x96xf32>
    %62 = arith.addf %58, %61 : vector<16x96xf32>
    %63 = vector.extract_strided_slice %62 {offsets = [0, 0], sizes = [16, 8], strides = [1, 1]} : vector<16x96xf32> to vector<16x8xf32>
    %64 = vector.shape_cast %63 : vector<16x8xf32> to vector<2x8x8xf32>
    %65 = vector.extract_strided_slice %62 {offsets = [0, 8], sizes = [16, 8], strides = [1, 1]} : vector<16x96xf32> to vector<16x8xf32>
    %66 = vector.shape_cast %65 : vector<16x8xf32> to vector<2x8x8xf32>
    %67 = vector.extract_strided_slice %62 {offsets = [0, 16], sizes = [16, 8], strides = [1, 1]} : vector<16x96xf32> to vector<16x8xf32>
    %68 = vector.shape_cast %67 : vector<16x8xf32> to vector<2x8x8xf32>
    %69 = vector.extract_strided_slice %62 {offsets = [0, 24], sizes = [16, 8], strides = [1, 1]} : vector<16x96xf32> to vector<16x8xf32>
    %70 = vector.shape_cast %69 : vector<16x8xf32> to vector<2x8x8xf32>
    %71 = tpu.concatenate %64, %66, %68, %70 in 0 : vector<2x8x8xf32>, vector<2x8x8xf32>, vector<2x8x8xf32>, vector<2x8x8xf32> -> vector<8x8x8xf32>
    %72 = vector.extract_strided_slice %62 {offsets = [0, 32], sizes = [16, 8], strides = [1, 1]} : vector<16x96xf32> to vector<16x8xf32>
    %73 = vector.shape_cast %72 : vector<16x8xf32> to vector<2x8x8xf32>
    %74 = vector.extract_strided_slice %62 {offsets = [0, 40], sizes = [16, 8], strides = [1, 1]} : vector<16x96xf32> to vector<16x8xf32>
    %75 = vector.shape_cast %74 : vector<16x8xf32> to vector<2x8x8xf32>
    %76 = vector.extract_strided_slice %62 {offsets = [0, 48], sizes = [16, 8], strides = [1, 1]} : vector<16x96xf32> to vector<16x8xf32>
    %77 = vector.shape_cast %76 : vector<16x8xf32> to vector<2x8x8xf32>
    %78 = vector.extract_strided_slice %62 {offsets = [0, 56], sizes = [16, 8], strides = [1, 1]} : vector<16x96xf32> to vector<16x8xf32>
    %79 = vector.shape_cast %78 : vector<16x8xf32> to vector<2x8x8xf32>
    %80 = tpu.concatenate %73, %75, %77, %79 in 0 : vector<2x8x8xf32>, vector<2x8x8xf32>, vector<2x8x8xf32>, vector<2x8x8xf32> -> vector<8x8x8xf32>
    %81 = vector.extract_strided_slice %62 {offsets = [0, 64], sizes = [16, 8], strides = [1, 1]} : vector<16x96xf32> to vector<16x8xf32>
    %82 = vector.shape_cast %81 : vector<16x8xf32> to vector<2x8x8xf32>
    %83 = vector.extract_strided_slice %62 {offsets = [0, 72], sizes = [16, 8], strides = [1, 1]} : vector<16x96xf32> to vector<16x8xf32>
    %84 = vector.shape_cast %83 : vector<16x8xf32> to vector<2x8x8xf32>
    %85 = vector.extract_strided_slice %62 {offsets = [0, 80], sizes = [16, 8], strides = [1, 1]} : vector<16x96xf32> to vector<16x8xf32>
    %86 = vector.shape_cast %85 : vector<16x8xf32> to vector<2x8x8xf32>
    %87 = vector.extract_strided_slice %62 {offsets = [0, 88], sizes = [16, 8], strides = [1, 1]} : vector<16x96xf32> to vector<16x8xf32>
    %88 = vector.shape_cast %87 : vector<16x8xf32> to vector<2x8x8xf32>
    %89 = tpu.concatenate %82, %84, %86, %88 in 0 : vector<2x8x8xf32>, vector<2x8x8xf32>, vector<2x8x8xf32>, vector<2x8x8xf32> -> vector<8x8x8xf32>
    %cst_21 = arith.constant dense<0.000000e+00> : vector<8x8x8xf32>
    %90 = tpu.matmul %71, %80, %cst_21 {dimension_numbers = #tpu.dot_dimension_numbers<[2], [2], [1], [1], [0, 0, 0, 1, 1, 1], [0], [0]>} : vector<8x8x8xf32>, vector<8x8x8xf32>, vector<8x8x8xf32> -> vector<8x8x8xf32>
    %cst_22 = arith.constant 0.353553385 : f32
    %91 = vector.broadcast %cst_22 : f32 to vector<8x8x8xf32>
    %92 = arith.mulf %90, %91 : vector<8x8x8xf32>
    %cst_23 = arith.constant dense<0xFF800000> : vector<8x8xf32>
    %93 = vector.multi_reduction <maximumf>, %92, %cst_23 [2] : vector<8x8x8xf32> to vector<8x8xf32>
    %94 = vector.shape_cast %93 : vector<8x8xf32> to vector<8x8x1xf32>
    %95 = vector.broadcast %94 : vector<8x8x1xf32> to vector<8x8x8xf32>
    %96 = arith.subf %92, %95 : vector<8x8x8xf32>
    %97 = math.exp %96 : vector<8x8x8xf32>
    %cst_24 = arith.constant dense<0.000000e+00> : vector<8x8xf32>
    %98 = vector.multi_reduction <add>, %97, %cst_24 [2] : vector<8x8x8xf32> to vector<8x8xf32>
    %99 = vector.shape_cast %98 : vector<8x8xf32> to vector<8x8x1xf32>
    %100 = vector.broadcast %99 : vector<8x8x1xf32> to vector<8x8x8xf32>
    %101 = arith.divf %97, %100 : vector<8x8x8xf32>
    %cst_25 = arith.constant dense<0.000000e+00> : vector<8x8x8xf32>
    %102 = tpu.matmul %101, %89, %cst_25 {dimension_numbers = #tpu.dot_dimension_numbers<[2], [1], [1], [2], [0, 0, 0, 1, 1, 2], [0], [0]>} : vector<8x8x8xf32>, vector<8x8x8xf32>, vector<8x8x8xf32> -> vector<8x8x8xf32>
    %103 = vector.extract_strided_slice %102 {offsets = [0, 0, 0], sizes = [2, 8, 8], strides = [1, 1, 1]} : vector<8x8x8xf32> to vector<2x8x8xf32>
    %104 = vector.shape_cast %103 : vector<2x8x8xf32> to vector<16x8xf32>
    %105 = vector.extract_strided_slice %102 {offsets = [2, 0, 0], sizes = [2, 8, 8], strides = [1, 1, 1]} : vector<8x8x8xf32> to vector<2x8x8xf32>
    %106 = vector.shape_cast %105 : vector<2x8x8xf32> to vector<16x8xf32>
    %107 = vector.extract_strided_slice %102 {offsets = [4, 0, 0], sizes = [2, 8, 8], strides = [1, 1, 1]} : vector<8x8x8xf32> to vector<2x8x8xf32>
    %108 = vector.shape_cast %107 : vector<2x8x8xf32> to vector<16x8xf32>
    %109 = vector.extract_strided_slice %102 {offsets = [6, 0, 0], sizes = [2, 8, 8], strides = [1, 1, 1]} : vector<8x8x8xf32> to vector<2x8x8xf32>
    %110 = vector.shape_cast %109 : vector<2x8x8xf32> to vector<16x8xf32>
    %111 = tpu.concatenate %104, %106, %108, %110 in 1 : vector<16x8xf32>, vector<16x8xf32>, vector<16x8xf32>, vector<16x8xf32> -> vector<16x32xf32>
    %cst_26 = arith.constant dense<0.000000e+00> : vector<16x32xf32>
    %112 = tpu.matmul %111, %53, %cst_26 {dimension_numbers = #tpu.dot_dimension_numbers<[1], [0], [0], [1], [0, 0, 1, 1], [], []>} : vector<16x32xf32>, vector<32x32xf32>, vector<16x32xf32> -> vector<16x32xf32>
    %c177 = arith.constant 177 : index
    %c0_27 = arith.constant 0 : index
    %113 = vector.load %arg1[%c177, %c0_27] : memref<304x128xbf16, #tpu.memory_space<vmem>>, vector<1x32xbf16>
    %114 = arith.extf %113 : vector<1x32xbf16> to vector<1x32xf32>
    %115 = vector.broadcast %114 : vector<1x32xf32> to vector<16x32xf32>
    %116 = arith.addf %112, %115 : vector<16x32xf32>
    %117 = arith.addf %49, %116 : vector<16x32xf32>
    %c178 = arith.constant 178 : index
    %c0_28 = arith.constant 0 : index
    %118 = vector.load %arg1[%c178, %c0_28] : memref<304x128xbf16, #tpu.memory_space<vmem>>, vector<1x32xbf16>
    %119 = arith.extf %118 : vector<1x32xbf16> to vector<1x32xf32>
    %c179 = arith.constant 179 : index
    %c0_29 = arith.constant 0 : index
    %120 = vector.load %arg1[%c179, %c0_29] : memref<304x128xbf16, #tpu.memory_space<vmem>>, vector<1x32xbf16>
    %121 = arith.extf %120 : vector<1x32xbf16> to vector<1x32xf32>
    %cst_30 = arith.constant dense<0.000000e+00> : vector<16xf32>
    %122 = vector.multi_reduction <add>, %117, %cst_30 [1] : vector<16x32xf32> to vector<16xf32>
    %123 = vector.shape_cast %122 : vector<16xf32> to vector<16x1xf32>
    %cst_31 = arith.constant 3.200000e+01 : f32
    %124 = vector.broadcast %cst_31 : f32 to vector<16x1xf32>
    %125 = arith.divf %123, %124 : vector<16x1xf32>
    %126 = vector.broadcast %125 : vector<16x1xf32> to vector<16x32xf32>
    %127 = arith.subf %117, %126 : vector<16x32xf32>
    %128 = arith.mulf %127, %127 : vector<16x32xf32>
    %cst_32 = arith.constant dense<0.000000e+00> : vector<16xf32>
    %129 = vector.multi_reduction <add>, %128, %cst_32 [1] : vector<16x32xf32> to vector<16xf32>
    %130 = vector.shape_cast %129 : vector<16xf32> to vector<16x1xf32>
    %cst_33 = arith.constant 3.200000e+01 : f32
    %131 = vector.broadcast %cst_33 : f32 to vector<16x1xf32>
    %132 = arith.divf %130, %131 : vector<16x1xf32>
    %cst_34 = arith.constant 9.99999974E-6 : f32
    %133 = vector.broadcast %cst_34 : f32 to vector<16x1xf32>
    %134 = arith.addf %132, %133 : vector<16x1xf32>
    %135 = math.rsqrt %134 : vector<16x1xf32>
    %136 = vector.broadcast %135 : vector<16x1xf32> to vector<16x32xf32>
    %137 = arith.mulf %127, %136 : vector<16x32xf32>
    %138 = vector.broadcast %119 : vector<1x32xf32> to vector<16x32xf32>
    %139 = arith.mulf %137, %138 : vector<16x32xf32>
    %140 = vector.broadcast %121 : vector<1x32xf32> to vector<16x32xf32>
    %141 = arith.addf %139, %140 : vector<16x32xf32>
    %cst_35 = arith.constant dense<0.000000e+00> : vector<16x64xf32>
    %142 = tpu.matmul %141, %57, %cst_35 {dimension_numbers = #tpu.dot_dimension_numbers<[1], [0], [0], [1], [0, 0, 1, 1], [], []>} : vector<16x32xf32>, vector<32x64xf32>, vector<16x64xf32> -> vector<16x64xf32>
    %c182 = arith.constant 182 : index
    %c0_36 = arith.constant 0 : index
    %143 = vector.load %arg1[%c182, %c0_36] : memref<304x128xbf16, #tpu.memory_space<vmem>>, vector<1x64xbf16>
    %144 = arith.extf %143 : vector<1x64xbf16> to vector<1x64xf32>
    %145 = vector.broadcast %144 : vector<1x64xf32> to vector<16x64xf32>
    %146 = arith.addf %142, %145 : vector<16x64xf32>
    %cst_37 = arith.constant 0.000000e+00 : f32
    %147 = vector.broadcast %cst_37 : f32 to vector<16x64xf32>
    %148 = arith.maximumf %146, %147 : vector<16x64xf32>
    %cst_38 = arith.constant dense<0.000000e+00> : vector<16x32xf32>
    %149 = tpu.matmul %148, %56, %cst_38 {dimension_numbers = #tpu.dot_dimension_numbers<[1], [0], [0], [1], [0, 0, 1, 1], [], []>} : vector<16x64xf32>, vector<64x32xf32>, vector<16x32xf32> -> vector<16x32xf32>
    %c183 = arith.constant 183 : index
    %c0_39 = arith.constant 0 : index
    %150 = vector.load %arg1[%c183, %c0_39] : memref<304x128xbf16, #tpu.memory_space<vmem>>, vector<1x32xbf16>
    %151 = arith.extf %150 : vector<1x32xbf16> to vector<1x32xf32>
    %152 = vector.broadcast %151 : vector<1x32xf32> to vector<16x32xf32>
    %153 = arith.addf %149, %152 : vector<16x32xf32>
    %154 = arith.addf %141, %153 : vector<16x32xf32>
    %c180 = arith.constant 180 : index
    %c0_40 = arith.constant 0 : index
    %155 = vector.load %arg1[%c180, %c0_40] : memref<304x128xbf16, #tpu.memory_space<vmem>>, vector<1x32xbf16>
    %156 = arith.extf %155 : vector<1x32xbf16> to vector<1x32xf32>
    %c181 = arith.constant 181 : index
    %c0_41 = arith.constant 0 : index
    %157 = vector.load %arg1[%c181, %c0_41] : memref<304x128xbf16, #tpu.memory_space<vmem>>, vector<1x32xbf16>
    %158 = arith.extf %157 : vector<1x32xbf16> to vector<1x32xf32>
    %cst_42 = arith.constant dense<0.000000e+00> : vector<16xf32>
    %159 = vector.multi_reduction <add>, %154, %cst_42 [1] : vector<16x32xf32> to vector<16xf32>
    %160 = vector.shape_cast %159 : vector<16xf32> to vector<16x1xf32>
    %cst_43 = arith.constant 3.200000e+01 : f32
    %161 = vector.broadcast %cst_43 : f32 to vector<16x1xf32>
    %162 = arith.divf %160, %161 : vector<16x1xf32>
    %163 = vector.broadcast %162 : vector<16x1xf32> to vector<16x32xf32>
    %164 = arith.subf %154, %163 : vector<16x32xf32>
    %165 = arith.mulf %164, %164 : vector<16x32xf32>
    %cst_44 = arith.constant dense<0.000000e+00> : vector<16xf32>
    %166 = vector.multi_reduction <add>, %165, %cst_44 [1] : vector<16x32xf32> to vector<16xf32>
    %167 = vector.shape_cast %166 : vector<16xf32> to vector<16x1xf32>
    %cst_45 = arith.constant 3.200000e+01 : f32
    %168 = vector.broadcast %cst_45 : f32 to vector<16x1xf32>
    %169 = arith.divf %167, %168 : vector<16x1xf32>
    %cst_46 = arith.constant 9.99999974E-6 : f32
    %170 = vector.broadcast %cst_46 : f32 to vector<16x1xf32>
    %171 = arith.addf %169, %170 : vector<16x1xf32>
    %172 = math.rsqrt %171 : vector<16x1xf32>
    %173 = vector.broadcast %172 : vector<16x1xf32> to vector<16x32xf32>
    %174 = arith.mulf %164, %173 : vector<16x32xf32>
    %175 = vector.broadcast %156 : vector<1x32xf32> to vector<16x32xf32>
    %176 = arith.mulf %174, %175 : vector<16x32xf32>
    %177 = vector.broadcast %158 : vector<1x32xf32> to vector<16x32xf32>
    %178 = arith.addf %176, %177 : vector<16x32xf32>
    %c192 = arith.constant 192 : index
    %c0_47 = arith.constant 0 : index
    %179 = vector.load %arg1[%c192, %c0_47] : memref<304x128xbf16, #tpu.memory_space<vmem>>, vector<32x128xbf16>
    %180 = arith.extf %179 : vector<32x128xbf16> to vector<32x128xf32>
    %181 = vector.extract_strided_slice %180 {offsets = [0, 0], sizes = [32, 96], strides = [1, 1]} : vector<32x128xf32> to vector<32x96xf32>
    %182 = vector.extract_strided_slice %180 {offsets = [0, 96], sizes = [32, 32], strides = [1, 1]} : vector<32x128xf32> to vector<32x32xf32>
    %c224 = arith.constant 224 : index
    %c0_48 = arith.constant 0 : index
    %183 = vector.load %arg1[%c224, %c0_48] : memref<304x128xbf16, #tpu.memory_space<vmem>>, vector<64x128xbf16>
    %184 = arith.extf %183 : vector<64x128xbf16> to vector<64x128xf32>
    %185 = vector.extract_strided_slice %184 {offsets = [0, 0], sizes = [64, 32], strides = [1, 1]} : vector<64x128xf32> to vector<64x32xf32>
    %186 = vector.extract_strided_slice %184 {offsets = [0, 32], sizes = [32, 64], strides = [1, 1]} : vector<64x128xf32> to vector<32x64xf32>
    %cst_49 = arith.constant dense<0.000000e+00> : vector<16x96xf32>
    %187 = tpu.matmul %178, %181, %cst_49 {dimension_numbers = #tpu.dot_dimension_numbers<[1], [0], [0], [1], [0, 0, 1, 1], [], []>} : vector<16x32xf32>, vector<32x96xf32>, vector<16x96xf32> -> vector<16x96xf32>
    %c288 = arith.constant 288 : index
    %c0_50 = arith.constant 0 : index
    %188 = vector.load %arg1[%c288, %c0_50] : memref<304x128xbf16, #tpu.memory_space<vmem>>, vector<1x96xbf16>
    %189 = arith.extf %188 : vector<1x96xbf16> to vector<1x96xf32>
    %190 = vector.broadcast %189 : vector<1x96xf32> to vector<16x96xf32>
    %191 = arith.addf %187, %190 : vector<16x96xf32>
    %192 = vector.extract_strided_slice %191 {offsets = [0, 0], sizes = [16, 8], strides = [1, 1]} : vector<16x96xf32> to vector<16x8xf32>
    %193 = vector.shape_cast %192 : vector<16x8xf32> to vector<2x8x8xf32>
    %194 = vector.extract_strided_slice %191 {offsets = [0, 8], sizes = [16, 8], strides = [1, 1]} : vector<16x96xf32> to vector<16x8xf32>
    %195 = vector.shape_cast %194 : vector<16x8xf32> to vector<2x8x8xf32>
    %196 = vector.extract_strided_slice %191 {offsets = [0, 16], sizes = [16, 8], strides = [1, 1]} : vector<16x96xf32> to vector<16x8xf32>
    %197 = vector.shape_cast %196 : vector<16x8xf32> to vector<2x8x8xf32>
    %198 = vector.extract_strided_slice %191 {offsets = [0, 24], sizes = [16, 8], strides = [1, 1]} : vector<16x96xf32> to vector<16x8xf32>
    %199 = vector.shape_cast %198 : vector<16x8xf32> to vector<2x8x8xf32>
    %200 = tpu.concatenate %193, %195, %197, %199 in 0 : vector<2x8x8xf32>, vector<2x8x8xf32>, vector<2x8x8xf32>, vector<2x8x8xf32> -> vector<8x8x8xf32>
    %201 = vector.extract_strided_slice %191 {offsets = [0, 32], sizes = [16, 8], strides = [1, 1]} : vector<16x96xf32> to vector<16x8xf32>
    %202 = vector.shape_cast %201 : vector<16x8xf32> to vector<2x8x8xf32>
    %203 = vector.extract_strided_slice %191 {offsets = [0, 40], sizes = [16, 8], strides = [1, 1]} : vector<16x96xf32> to vector<16x8xf32>
    %204 = vector.shape_cast %203 : vector<16x8xf32> to vector<2x8x8xf32>
    %205 = vector.extract_strided_slice %191 {offsets = [0, 48], sizes = [16, 8], strides = [1, 1]} : vector<16x96xf32> to vector<16x8xf32>
    %206 = vector.shape_cast %205 : vector<16x8xf32> to vector<2x8x8xf32>
    %207 = vector.extract_strided_slice %191 {offsets = [0, 56], sizes = [16, 8], strides = [1, 1]} : vector<16x96xf32> to vector<16x8xf32>
    %208 = vector.shape_cast %207 : vector<16x8xf32> to vector<2x8x8xf32>
    %209 = tpu.concatenate %202, %204, %206, %208 in 0 : vector<2x8x8xf32>, vector<2x8x8xf32>, vector<2x8x8xf32>, vector<2x8x8xf32> -> vector<8x8x8xf32>
    %210 = vector.extract_strided_slice %191 {offsets = [0, 64], sizes = [16, 8], strides = [1, 1]} : vector<16x96xf32> to vector<16x8xf32>
    %211 = vector.shape_cast %210 : vector<16x8xf32> to vector<2x8x8xf32>
    %212 = vector.extract_strided_slice %191 {offsets = [0, 72], sizes = [16, 8], strides = [1, 1]} : vector<16x96xf32> to vector<16x8xf32>
    %213 = vector.shape_cast %212 : vector<16x8xf32> to vector<2x8x8xf32>
    %214 = vector.extract_strided_slice %191 {offsets = [0, 80], sizes = [16, 8], strides = [1, 1]} : vector<16x96xf32> to vector<16x8xf32>
    %215 = vector.shape_cast %214 : vector<16x8xf32> to vector<2x8x8xf32>
    %216 = vector.extract_strided_slice %191 {offsets = [0, 88], sizes = [16, 8], strides = [1, 1]} : vector<16x96xf32> to vector<16x8xf32>
    %217 = vector.shape_cast %216 : vector<16x8xf32> to vector<2x8x8xf32>
    %218 = tpu.concatenate %211, %213, %215, %217 in 0 : vector<2x8x8xf32>, vector<2x8x8xf32>, vector<2x8x8xf32>, vector<2x8x8xf32> -> vector<8x8x8xf32>
    %cst_51 = arith.constant dense<0.000000e+00> : vector<8x8x8xf32>
    %219 = tpu.matmul %200, %209, %cst_51 {dimension_numbers = #tpu.dot_dimension_numbers<[2], [2], [1], [1], [0, 0, 0, 1, 1, 1], [0], [0]>} : vector<8x8x8xf32>, vector<8x8x8xf32>, vector<8x8x8xf32> -> vector<8x8x8xf32>
    %cst_52 = arith.constant 0.353553385 : f32
    %220 = vector.broadcast %cst_52 : f32 to vector<8x8x8xf32>
    %221 = arith.mulf %219, %220 : vector<8x8x8xf32>
    %cst_53 = arith.constant dense<0xFF800000> : vector<8x8xf32>
    %222 = vector.multi_reduction <maximumf>, %221, %cst_53 [2] : vector<8x8x8xf32> to vector<8x8xf32>
    %223 = vector.shape_cast %222 : vector<8x8xf32> to vector<8x8x1xf32>
    %224 = vector.broadcast %223 : vector<8x8x1xf32> to vector<8x8x8xf32>
    %225 = arith.subf %221, %224 : vector<8x8x8xf32>
    %226 = math.exp %225 : vector<8x8x8xf32>
    %cst_54 = arith.constant dense<0.000000e+00> : vector<8x8xf32>
    %227 = vector.multi_reduction <add>, %226, %cst_54 [2] : vector<8x8x8xf32> to vector<8x8xf32>
    %228 = vector.shape_cast %227 : vector<8x8xf32> to vector<8x8x1xf32>
    %229 = vector.broadcast %228 : vector<8x8x1xf32> to vector<8x8x8xf32>
    %230 = arith.divf %226, %229 : vector<8x8x8xf32>
    %cst_55 = arith.constant dense<0.000000e+00> : vector<8x8x8xf32>
    %231 = tpu.matmul %230, %218, %cst_55 {dimension_numbers = #tpu.dot_dimension_numbers<[2], [1], [1], [2], [0, 0, 0, 1, 1, 2], [0], [0]>} : vector<8x8x8xf32>, vector<8x8x8xf32>, vector<8x8x8xf32> -> vector<8x8x8xf32>
    %232 = vector.extract_strided_slice %231 {offsets = [0, 0, 0], sizes = [2, 8, 8], strides = [1, 1, 1]} : vector<8x8x8xf32> to vector<2x8x8xf32>
    %233 = vector.shape_cast %232 : vector<2x8x8xf32> to vector<16x8xf32>
    %234 = vector.extract_strided_slice %231 {offsets = [2, 0, 0], sizes = [2, 8, 8], strides = [1, 1, 1]} : vector<8x8x8xf32> to vector<2x8x8xf32>
    %235 = vector.shape_cast %234 : vector<2x8x8xf32> to vector<16x8xf32>
    %236 = vector.extract_strided_slice %231 {offsets = [4, 0, 0], sizes = [2, 8, 8], strides = [1, 1, 1]} : vector<8x8x8xf32> to vector<2x8x8xf32>
    %237 = vector.shape_cast %236 : vector<2x8x8xf32> to vector<16x8xf32>
    %238 = vector.extract_strided_slice %231 {offsets = [6, 0, 0], sizes = [2, 8, 8], strides = [1, 1, 1]} : vector<8x8x8xf32> to vector<2x8x8xf32>
    %239 = vector.shape_cast %238 : vector<2x8x8xf32> to vector<16x8xf32>
    %240 = tpu.concatenate %233, %235, %237, %239 in 1 : vector<16x8xf32>, vector<16x8xf32>, vector<16x8xf32>, vector<16x8xf32> -> vector<16x32xf32>
    %cst_56 = arith.constant dense<0.000000e+00> : vector<16x32xf32>
    %241 = tpu.matmul %240, %182, %cst_56 {dimension_numbers = #tpu.dot_dimension_numbers<[1], [0], [0], [1], [0, 0, 1, 1], [], []>} : vector<16x32xf32>, vector<32x32xf32>, vector<16x32xf32> -> vector<16x32xf32>
    %c289 = arith.constant 289 : index
    %c0_57 = arith.constant 0 : index
    %242 = vector.load %arg1[%c289, %c0_57] : memref<304x128xbf16, #tpu.memory_space<vmem>>, vector<1x32xbf16>
    %243 = arith.extf %242 : vector<1x32xbf16> to vector<1x32xf32>
    %244 = vector.broadcast %243 : vector<1x32xf32> to vector<16x32xf32>
    %245 = arith.addf %241, %244 : vector<16x32xf32>
    %246 = arith.addf %178, %245 : vector<16x32xf32>
    %c290 = arith.constant 290 : index
    %c0_58 = arith.constant 0 : index
    %247 = vector.load %arg1[%c290, %c0_58] : memref<304x128xbf16, #tpu.memory_space<vmem>>, vector<1x32xbf16>
    %248 = arith.extf %247 : vector<1x32xbf16> to vector<1x32xf32>
    %c291 = arith.constant 291 : index
    %c0_59 = arith.constant 0 : index
    %249 = vector.load %arg1[%c291, %c0_59] : memref<304x128xbf16, #tpu.memory_space<vmem>>, vector<1x32xbf16>
    %250 = arith.extf %249 : vector<1x32xbf16> to vector<1x32xf32>
    %cst_60 = arith.constant dense<0.000000e+00> : vector<16xf32>
    %251 = vector.multi_reduction <add>, %246, %cst_60 [1] : vector<16x32xf32> to vector<16xf32>
    %252 = vector.shape_cast %251 : vector<16xf32> to vector<16x1xf32>
    %cst_61 = arith.constant 3.200000e+01 : f32
    %253 = vector.broadcast %cst_61 : f32 to vector<16x1xf32>
    %254 = arith.divf %252, %253 : vector<16x1xf32>
    %255 = vector.broadcast %254 : vector<16x1xf32> to vector<16x32xf32>
    %256 = arith.subf %246, %255 : vector<16x32xf32>
    %257 = arith.mulf %256, %256 : vector<16x32xf32>
    %cst_62 = arith.constant dense<0.000000e+00> : vector<16xf32>
    %258 = vector.multi_reduction <add>, %257, %cst_62 [1] : vector<16x32xf32> to vector<16xf32>
    %259 = vector.shape_cast %258 : vector<16xf32> to vector<16x1xf32>
    %cst_63 = arith.constant 3.200000e+01 : f32
    %260 = vector.broadcast %cst_63 : f32 to vector<16x1xf32>
    %261 = arith.divf %259, %260 : vector<16x1xf32>
    %cst_64 = arith.constant 9.99999974E-6 : f32
    %262 = vector.broadcast %cst_64 : f32 to vector<16x1xf32>
    %263 = arith.addf %261, %262 : vector<16x1xf32>
    %264 = math.rsqrt %263 : vector<16x1xf32>
    %265 = vector.broadcast %264 : vector<16x1xf32> to vector<16x32xf32>
    %266 = arith.mulf %256, %265 : vector<16x32xf32>
    %267 = vector.broadcast %248 : vector<1x32xf32> to vector<16x32xf32>
    %268 = arith.mulf %266, %267 : vector<16x32xf32>
    %269 = vector.broadcast %250 : vector<1x32xf32> to vector<16x32xf32>
    %270 = arith.addf %268, %269 : vector<16x32xf32>
    %cst_65 = arith.constant dense<0.000000e+00> : vector<16x64xf32>
    %271 = tpu.matmul %270, %186, %cst_65 {dimension_numbers = #tpu.dot_dimension_numbers<[1], [0], [0], [1], [0, 0, 1, 1], [], []>} : vector<16x32xf32>, vector<32x64xf32>, vector<16x64xf32> -> vector<16x64xf32>
    %c294 = arith.constant 294 : index
    %c0_66 = arith.constant 0 : index
    %272 = vector.load %arg1[%c294, %c0_66] : memref<304x128xbf16, #tpu.memory_space<vmem>>, vector<1x64xbf16>
    %273 = arith.extf %272 : vector<1x64xbf16> to vector<1x64xf32>
    %274 = vector.broadcast %273 : vector<1x64xf32> to vector<16x64xf32>
    %275 = arith.addf %271, %274 : vector<16x64xf32>
    %cst_67 = arith.constant 0.000000e+00 : f32
    %276 = vector.broadcast %cst_67 : f32 to vector<16x64xf32>
    %277 = arith.maximumf %275, %276 : vector<16x64xf32>
    %cst_68 = arith.constant dense<0.000000e+00> : vector<16x32xf32>
    %278 = tpu.matmul %277, %185, %cst_68 {dimension_numbers = #tpu.dot_dimension_numbers<[1], [0], [0], [1], [0, 0, 1, 1], [], []>} : vector<16x64xf32>, vector<64x32xf32>, vector<16x32xf32> -> vector<16x32xf32>
    %c295 = arith.constant 295 : index
    %c0_69 = arith.constant 0 : index
    %279 = vector.load %arg1[%c295, %c0_69] : memref<304x128xbf16, #tpu.memory_space<vmem>>, vector<1x32xbf16>
    %280 = arith.extf %279 : vector<1x32xbf16> to vector<1x32xf32>
    %281 = vector.broadcast %280 : vector<1x32xf32> to vector<16x32xf32>
    %282 = arith.addf %278, %281 : vector<16x32xf32>
    %283 = arith.addf %270, %282 : vector<16x32xf32>
    %c292 = arith.constant 292 : index
    %c0_70 = arith.constant 0 : index
    %284 = vector.load %arg1[%c292, %c0_70] : memref<304x128xbf16, #tpu.memory_space<vmem>>, vector<1x32xbf16>
    %285 = arith.extf %284 : vector<1x32xbf16> to vector<1x32xf32>
    %c293 = arith.constant 293 : index
    %c0_71 = arith.constant 0 : index
    %286 = vector.load %arg1[%c293, %c0_71] : memref<304x128xbf16, #tpu.memory_space<vmem>>, vector<1x32xbf16>
    %287 = arith.extf %286 : vector<1x32xbf16> to vector<1x32xf32>
    %cst_72 = arith.constant dense<0.000000e+00> : vector<16xf32>
    %288 = vector.multi_reduction <add>, %283, %cst_72 [1] : vector<16x32xf32> to vector<16xf32>
    %289 = vector.shape_cast %288 : vector<16xf32> to vector<16x1xf32>
    %cst_73 = arith.constant 3.200000e+01 : f32
    %290 = vector.broadcast %cst_73 : f32 to vector<16x1xf32>
    %291 = arith.divf %289, %290 : vector<16x1xf32>
    %292 = vector.broadcast %291 : vector<16x1xf32> to vector<16x32xf32>
    %293 = arith.subf %283, %292 : vector<16x32xf32>
    %294 = arith.mulf %293, %293 : vector<16x32xf32>
    %cst_74 = arith.constant dense<0.000000e+00> : vector<16xf32>
    %295 = vector.multi_reduction <add>, %294, %cst_74 [1] : vector<16x32xf32> to vector<16xf32>
    %296 = vector.shape_cast %295 : vector<16xf32> to vector<16x1xf32>
    %cst_75 = arith.constant 3.200000e+01 : f32
    %297 = vector.broadcast %cst_75 : f32 to vector<16x1xf32>
    %298 = arith.divf %296, %297 : vector<16x1xf32>
    %cst_76 = arith.constant 9.99999974E-6 : f32
    %299 = vector.broadcast %cst_76 : f32 to vector<16x1xf32>
    %300 = arith.addf %298, %299 : vector<16x1xf32>
    %301 = math.rsqrt %300 : vector<16x1xf32>
    %302 = vector.broadcast %301 : vector<16x1xf32> to vector<16x32xf32>
    %303 = arith.mulf %293, %302 : vector<16x32xf32>
    %304 = vector.broadcast %285 : vector<1x32xf32> to vector<16x32xf32>
    %305 = arith.mulf %303, %304 : vector<16x32xf32>
    %306 = vector.broadcast %287 : vector<1x32xf32> to vector<16x32xf32>
    %307 = arith.addf %305, %306 : vector<16x32xf32>
    %c49 = arith.constant 49 : index
    %c0_77 = arith.constant 0 : index
    %308 = vector.load %arg1[%c49, %c0_77] : memref<304x128xbf16, #tpu.memory_space<vmem>>, vector<1x32xbf16>
    %309 = arith.extf %308 : vector<1x32xbf16> to vector<1x32xf32>
    %c50 = arith.constant 50 : index
    %c0_78 = arith.constant 0 : index
    %310 = vector.load %arg1[%c50, %c0_78] : memref<304x128xbf16, #tpu.memory_space<vmem>>, vector<1x32xbf16>
    %311 = arith.extf %310 : vector<1x32xbf16> to vector<1x32xf32>
    %cst_79 = arith.constant dense<0.000000e+00> : vector<16xf32>
    %312 = vector.multi_reduction <add>, %307, %cst_79 [1] : vector<16x32xf32> to vector<16xf32>
    %313 = vector.shape_cast %312 : vector<16xf32> to vector<16x1xf32>
    %cst_80 = arith.constant 3.200000e+01 : f32
    %314 = vector.broadcast %cst_80 : f32 to vector<16x1xf32>
    %315 = arith.divf %313, %314 : vector<16x1xf32>
    %316 = vector.broadcast %315 : vector<16x1xf32> to vector<16x32xf32>
    %317 = arith.subf %307, %316 : vector<16x32xf32>
    %318 = arith.mulf %317, %317 : vector<16x32xf32>
    %cst_81 = arith.constant dense<0.000000e+00> : vector<16xf32>
    %319 = vector.multi_reduction <add>, %318, %cst_81 [1] : vector<16x32xf32> to vector<16xf32>
    %320 = vector.shape_cast %319 : vector<16xf32> to vector<16x1xf32>
    %cst_82 = arith.constant 3.200000e+01 : f32
    %321 = vector.broadcast %cst_82 : f32 to vector<16x1xf32>
    %322 = arith.divf %320, %321 : vector<16x1xf32>
    %cst_83 = arith.constant 9.99999974E-6 : f32
    %323 = vector.broadcast %cst_83 : f32 to vector<16x1xf32>
    %324 = arith.addf %322, %323 : vector<16x1xf32>
    %325 = math.rsqrt %324 : vector<16x1xf32>
    %326 = vector.broadcast %325 : vector<16x1xf32> to vector<16x32xf32>
    %327 = arith.mulf %317, %326 : vector<16x32xf32>
    %328 = vector.broadcast %309 : vector<1x32xf32> to vector<16x32xf32>
    %329 = arith.mulf %327, %328 : vector<16x32xf32>
    %330 = vector.broadcast %311 : vector<1x32xf32> to vector<16x32xf32>
    %331 = arith.addf %329, %330 : vector<16x32xf32>
    %cst_84 = arith.constant 5.000000e-01 : f32
    %332 = vector.broadcast %cst_84 : f32 to vector<16x32xf32>
    %333 = arith.mulf %332, %331 : vector<16x32xf32>
    %334 = math.tanh %333 : vector<16x32xf32>
    %cst_85 = arith.constant 5.000000e-01 : f32
    %335 = vector.broadcast %cst_85 : f32 to vector<16x32xf32>
    %336 = arith.mulf %335, %334 : vector<16x32xf32>
    %cst_86 = arith.constant 5.000000e-01 : f32
    %337 = vector.broadcast %cst_86 : f32 to vector<16x32xf32>
    %338 = arith.addf %336, %337 : vector<16x32xf32>
    %c16 = arith.constant 16 : index
    %c0_87 = arith.constant 0 : index
    %339 = vector.load %arg1[%c16, %c0_87] : memref<304x128xbf16, #tpu.memory_space<vmem>>, vector<32x128xbf16>
    %340 = arith.extf %339 : vector<32x128xbf16> to vector<32x128xf32>
    %c51 = arith.constant 51 : index
    %c0_88 = arith.constant 0 : index
    %341 = vector.load %arg1[%c51, %c0_88] : memref<304x128xbf16, #tpu.memory_space<vmem>>, vector<1x128xbf16>
    %342 = arith.extf %341 : vector<1x128xbf16> to vector<1x128xf32>
    %cst_89 = arith.constant dense<0.000000e+00> : vector<16x128xf32>
    %343 = tpu.matmul %338, %340, %cst_89 {dimension_numbers = #tpu.dot_dimension_numbers<[1], [0], [0], [1], [0, 0, 1, 1], [], []>} : vector<16x32xf32>, vector<32x128xf32>, vector<16x128xf32> -> vector<16x128xf32>
    %344 = vector.broadcast %342 : vector<1x128xf32> to vector<16x128xf32>
    %345 = arith.addf %343, %344 : vector<16x128xf32>
    %c0_90 = arith.constant 0 : index
    %c0_91 = arith.constant 0 : index
    %346 = vector.load %arg2[%c0_90, %c0_91] : memref<16x128xf32, #tpu.memory_space<vmem>>, vector<16x128xf32>
    tpu.vector_store %arg2[%c0_90, %c0_91], %345 {strides = array<i32>} : memref<16x128xf32, #tpu.memory_space<vmem>>, vector<16x128xf32>,
    return
  }
}

</mosaic_0001>

<bundles_post_ra>
// kernel: transformer_forward.1
= control target key start
LH: loop header
LB: loop body
LE: loop exit
PB: predicated region body
PF: predicated region fallthrough
CT: control target
= control target key end

     0   :  { %7 = vsyncpa [#allocation3], 0  ;;  %s3034_s0 = inlined_call_operand.hbm [shape: f32[2,8,16], index: 0, kind: input, shape index: {}]   ;;  %s3035_s1 = inlined_call_operand.hbm [shape: bf16[304,128], index: 1, kind: input, shape index: {}]   ;;  %s3036_s2 = inlined_call_operand.vmem [shape: f32[16,128], index: 2, kind: output, shape index: {}]  }
   0x1   :  { %s13_s11 = sshll.u32 %s3034_s0, 4  ;;  %s14_s11 = int_to_ptr.hbm [resolvable:$true] %s13_s11 }
   0x2   :  { %8 = vsyncpa [#allocation5], 0  ;;  %s2533_s12 = smov [#allocation2]   ;;  %s26_s16 = sshll.u32 %s3035_s1, 4  ;;  %s27_s16 = int_to_ptr.hbm [resolvable:$true] %s26_s16 }
   0x3   :  { %s15_s13 = sshll.u32 %s2533_s12, 4  ;;  %s2534_s17 = smov 128   ;;  %s16_s13 = int_to_ptr.vmem [resolvable:$true] %s15_s13 }
   0x4   :  { %s2535_s18 = smov 8   ;;  %s2536_s19 = smov [#allocation4]  }
   0x5   :  { %21 = dma.hbm_to_vmem [thread:$0]  %s14_s11, 256, %s16_s13, [#allocation3], %s2534_s17, %s2534_s17, %s2535_s18  }
   0x6   :  { %s28_s20 = sshll.u32 %s2536_s19, 4  ;;  %s2537_s21 = smov 64   ;;  %s29_s20 = int_to_ptr.vmem [resolvable:$true] %s28_s20 }
   0x7   :  { %s2538_s22 = smov 4  }
   0x8   :  { %34 = dma.hbm_to_vmem [thread:$0]  %s27_s16, 2432, %s29_s20, [#allocation5], %s2537_s21, %s2537_s21, %s2538_s22  }
   0x9   :  { %2529 = dma.done.wait [#allocation3], 256  }
   0xa   :  { %2530 = vsyncadd [#allocation3], 4294967040 }
   0xb   :  { %2531 = dma.done.wait [#allocation5], 2432  }
   0xc   :  { %2532 = vsyncadd [#allocation5], 4294964864  ;;  %v2225_v0 = vld [vmem:[#allocation4] sm:$0xff]   ;;  %v43_v3 = vld [vmem:[#allocation2] sm:$0xff]  ;;  %vm52_vm0 = vcmask 130048   ;;  %vm82_vm1 = vcmask 261120  }
   0xd   :  { %v2227_v1 = vunpack.c.h.bf16 %v2225_v0  ;;  %v2226_v2 = vunpack.c.l.bf16 %v2225_v0  ;;  %v44_v4 = vld [vmem:[#allocation2 + $0x8] sm:$0xff]  ;;  %v2539_v18 = vmov 64.0   ;;  %v2285_v25 = vld [vmem:[#allocation4 + $0x30] sm:$0xff]   ;;  %v2284_v26 = vld [vmem:[#allocation4 + $0x28] sm:$0xff]   ;;  %s2540_s0 = smov 104   ;;  %s2541_s1 = smov 120  }
   0xe   :  { %v2574_v5 = vld [vmem:[#allocation4 + $0x18] sm:$0x1]  ;;  %2383 = vrcp.f32 %v2539_v18  ;;  %v2235_v27 = vunpack.c.h.bf16 %v2285_v25  ;;  %v2234_v28 = vunpack.c.l.bf16 %v2285_v25  ;;  %v2231_v29 = vunpack.c.h.bf16 %v2284_v26  ;;  %v121_v48 = vld [vmem:[#allocation4 + $0x1c] sm:$0xff]   ;;  %s2542_s23 = smov 112   ;;  %s2543_s24 = smov 96  }
   0xf   :  { %73 = vmatpush.msra.mxu0 %v2227_v1  ;;  %v50_v6 = vunpack.c.l.bf16 %v2574_v5  ;;  %v2230_v30 = vunpack.c.l.bf16 %v2284_v26  ;;  %v122_v50 = vunpack.c.l.bf16 %v121_v48  ;;  %v124_v55 = vunpack.c.h.bf16 %v121_v48  ;;  %s2544_s25 = smov 32   ;;  %s2545_s26 = smov 16  }
  0x10   :  { %185 = vmatpush.msra.mxu1 %v2235_v27  ;;  %v2588_v32 = vpack.i.bf16 %v2234_v28, %v2235_v27  ;;  %vm212_vm6 = vcmask 64512   ;;  %s2546_s27 = smov 24  }
  0x11   :  { %74 = vmatpush.msra.mxu0 %v2226_v2  ;;  %v51_v7 = vperm.slane %v50_v6, 0  ;;  %v2590_v33 = vpack.i.bf16 %v2230_v30, %v2231_v29 }
  0x12   :  { %2156 = vmatmul.msk.f32.vlgmr.msra.gmra.mxu0 %vm52_vm0, %v43_v3  ;;  %186 = vmatpush.msra.mxu1 %v2234_v28 }
  0x14   :  { %v2384_v19 = vpop.eup %2383  ;;  %187 = vmatpush.msra.mxu1 %v2231_v29 }
  0x15   :  { %v100_v20 = vmul.f32 64.0, %v2384_v19  ;;  %vm104_vm2 = vweird.f32 %v2384_v19 }
  0x16   :  { %188 = vmatpush.msra.mxu1 %v2230_v30 }
  0x17   :  { %v101_v21 = vsub.f32 1.0, %v100_v20 }
  0x19   :  { %v102_v23 = vmul.f32 %v2384_v19, %v101_v21 }
  0x1a   :  { %2157 = vmatmul.msk.f32.gmra.mxu0 %vm52_vm0, %v44_v4 }
  0x1b   :  { %v103_v31 = vadd.f32 %v2384_v19, %v102_v23 }
  0x1d   :  { %v105_v34 = vsel %vm104_vm2, %v2384_v19, %v103_v31 }
  0x8f   :  { %v76_v8 = vpop.f32.mrf.mxu0 }
  0x90   :  { %v2579_v9 = vadd.f32 %v76_v8, %v51_v7 }
  0x92   :  { %v83_v10 = vsel %vm82_vm1, %v2579_v9, 0.0  ;;  %v90_v11 = vmul.f32 %v2579_v9, %v2579_v9 }
  0x93   :  { %84 = vadd.xlane.f32.xlu0 %v83_v10 }
  0x94   :  { %v92_v12 = vsel %vm82_vm1, %v90_v11, 0.0 }
  0x95   :  { %93 = vadd.xlane.f32.xlu1 %v92_v12 }
  0x97   :  { %v79_v13 = vpop.f32.mrf.mxu0 }
  0x98   :  { %v80_v14 = vadd.f32 %v79_v13, %v51_v7  ;;  %v2601_v7 = vld [vmem:[#allocation4 + $0x58] sm:$0x1] }
  0x99   :  { %v165_v8 = vunpack.c.l.bf16 %v2601_v7 }
  0x9a   :  { %v86_v15 = vsel %vm82_vm1, %v80_v14, 0.0  ;;  %v91_v16 = vmul.f32 %v80_v14, %v80_v14 }
  0x9b   :  { %87 = vadd.xlane.f32.xlu0 %v86_v15 }
  0x9c   :  { %v95_v17 = vsel %vm82_vm1, %v91_v16, 0.0 }
  0x9d   :  { %96 = vadd.xlane.f32.xlu1 %v95_v17 }
 0x106   :  { %v85_v22 = vpop.xlane.xlu0 %84 }
 0x108   :  { %v94_v24 = vpop.xlane.xlu1 %93 }
 0x10e   :  { %v88_v35 = vpop.xlane.xlu0 %87 }
 0x10f   :  { %v89_v36 = vadd.f32 %v88_v35, %v85_v22 }
 0x110   :  { %v97_v37 = vpop.xlane.xlu1 %96 }
 0x111   :  { %v106_v38 = vmul.f32 %v105_v34, %v89_v36  ;;  %v98_v39 = vadd.f32 %v97_v37, %v94_v24 }
 0x113   :  { %v107_v40 = vmul.f32 %v105_v34, %v98_v39  ;;  %v108_v41 = vmul.f32 %v106_v38, %v106_v38  ;;  %v125_v53 = vsub.f32 %v2579_v9, %v106_v38  ;;  %v126_v54 = vsub.f32 %v80_v14, %v106_v38 }
 0x114   :  { %v166_v9 = vperm.slane %v165_v8, 0 }
 0x115   :  { %v109_v42 = vsub.f32 %v107_v40, %v108_v41 }
 0x117   :  { %v110_v43 = vadd.f32 1e-05, %v109_v42 }
 0x119   :  { %2385 = vrsqrt.f32 %v110_v43  ;;  %vm117_vm4 = vweird.f32 %v110_v43 }
 0x11f   :  { %v2386_v44 = vpop.eup %2385 }
 0x120   :  { %v112_v45 = vmul.f32 %v2386_v44, %v110_v43  ;;  %vm118_vm3 = vweird.f32 %v2386_v44 }
 0x121   :  { %vm119_vm5 = vmor %vm117_vm4, %vm118_vm3 }
 0x122   :  { %v113_v46 = vmul.f32 %v2386_v44, %v112_v45 }
 0x124   :  { %v114_v47 = vmul.f32 0.5, %v113_v46 }
 0x126   :  { %v115_v49 = vsub.f32 1.5, %v114_v47 }
 0x128   :  { %v116_v51 = vmul.f32 %v2386_v44, %v115_v49 }
 0x12a   :  { %v120_v52 = vsel %vm119_vm5, %v2386_v44, %v116_v51 }
 0x12b   :  { %v127_v56 = vmul.f32 %v122_v50, %v120_v52 }
 0x12d   :  { %v128_v57 = vmul.f32 %v127_v56, %v125_v53  ;;  %v129_v58 = vmul.f32 %v127_v56, %v126_v54 }
 0x12f   :  { %v130_v59 = vadd.f32 %v128_v57, %v124_v55  ;;  %v131_v60 = vadd.f32 %v129_v58, %v124_v55 }
 0x131   :  { %v132_v61 = vmul.f32 0.5, %v130_v59  ;;  %v133_v62 = vmul.f32 0.5, %v131_v60 }
 0x133   :  { %2387 = vtanh.f32 %v132_v61 }
 0x134   :  { %2389 = vtanh.f32 %v133_v62 }
 0x139   :  { %v2388_v63 = vpop.eup %2387 }
 0x13a   :  { %v136_v0 = vmul.f32 0.5, %v2388_v63  ;;  %v2390_v2 = vpop.eup %2389 }
 0x13b   :  { %v137_v3 = vmul.f32 0.5, %v2390_v2 }
 0x13c   :  { %v2593_v1 = vadd.f32 0.5, %v136_v0 }
 0x13d   :  { %v2597_v4 = vadd.f32 0.5, %v137_v3 }
 0x13e   :  { %2158 = vmatmul.msk.f32.vlgmr.msra.gmra.mxu1 %vm82_vm1, %v2593_v1 }
 0x146   :  { %2159 = vmatmul.msk.f32.gmra.mxu1 %vm82_vm1, %v2597_v4 }
 0x1bb   :  { %v190_v10 = vpop.f32.mrf.mxu1 }
 0x1bc   :  { %v2606_v11 = vadd.f32 %v190_v10, %v166_v9 }
 0x1be   :  { %206 = vrot.lane.b32.xlu0 %v2606_v11, %s2540_s0  ;;  %198 = vrot.lane.b32.xlu2 %v2606_v11, %s2541_s1 }
 0x1c3   :  { %v193_v12 = vpop.f32.mrf.mxu1 }
 0x1c4   :  { %v2612_v13 = vadd.f32 %v193_v12, %v166_v9 }
 0x1c6   :  { %204 = vrot.lane.b32.xlu1 %v2612_v13, %s2542_s23  ;;  %237 = vrot.lane.b32.xlu0 %v2612_v13, %s2543_s24 }
 0x1c7   :  { %200 = vrot.lane.b32.xlu2 %v2612_v13, %s2541_s1 }
 0x1cf   :  { %202 = vrot.lane.b32.xlu2 %v2606_v11, %s2542_s23 }
 0x1d7   :  { %208 = vrot.lane.b32.xlu2 %v2612_v13, %s2540_s0 }
 0x1df   :  { %210 = vrot.lane.b32.xlu2 %v2606_v11, %s2543_s24 }
 0x218   :  { %v2626_v14 = vpop.permute.xlu2 %198 }
 0x219   :  { %263 = vrot.lane.b32.xlu2 %v2626_v14, %s2543_s24  ;;  %v2313_v2 = vpack.i.bf16 %v2606_v11, %v2626_v14 }
 0x221   :  { %v2630_v15 = vpop.permute.xlu2 %200 }
 0x222   :  { %289 = vrot.lane.b32.xlu1 %v2630_v15, %s2543_s24 }
 0x229   :  { %v2634_v16 = vpop.permute.xlu2 %202 }
 0x22a   :  { %315 = vrot.lane.b32.xlu1 %v2634_v16, %s2543_s24 }
 0x230   :  { %v207_v17 = vpop.permute.xlu0 %206 }
 0x231   :  { %v2638_v18 = vpop.permute.xlu2 %208  ;;  %367 = vrot.lane.b32.xlu0 %v207_v17, %s2543_s24  ;;  %v2318_v48 = vpack.i.bf16 %v207_v17, %v2612_v13 }
 0x238   :  { %v2641_v19 = vpop.permute.xlu1 %204  ;;  %v238_v20 = vpop.permute.xlu0 %237 }
 0x239   :  { %v211_v21 = vpop.permute.xlu2 %210  ;;  %2162 = vmatpush.xpose.msk.msra.mxu3 %vm212_vm6, %v238_v20  ;;  %341 = vrot.lane.b32.xlu2 %v2641_v19, %s2543_s24 }
 0x23a   :  { %393 = vrot.lane.b32.xlu0 %v2638_v18, %s2543_s24  ;;  %2160 = vmatpush.xpose.msk.msra.mxu2 %vm212_vm6, %v211_v21 }
 0x23c   :  { %2163 = vmatmul.msk.f32.vlgmr.msra.gmra.mxu3 %vm212_vm6, %v2612_v13 }
 0x23d   :  { %2161 = vmatmul.msk.f32.vlgmr.msra.gmra.mxu2 %vm212_vm6, %v2606_v11 }
 0x273   :  { %v264_v22 = vpop.permute.xlu2 %263 }
 0x274   :  { %2164 = vmatpush.xpose.msk.msrb.mxu2 %vm212_vm6, %v264_v22 }
 0x277   :  { %2165 = vmatmul.msk.f32.vlgmr.msrb.gmra.mxu2 %vm212_vm6, %v2626_v14 }
 0x293   :  { %v342_v23 = vpop.permute.xlu2 %341 }
 0x294   :  { %v290_v24 = vpop.permute.xlu1 %289  ;;  %2170 = vmatpush.xpose.msk.msra.mxu2 %vm212_vm6, %v342_v23 }
 0x295   :  { %2166 = vmatpush.xpose.msk.msrb.mxu3 %vm212_vm6, %v290_v24 }
 0x297   :  { %2171 = vmatmul.msk.f32.vlgmr.msra.gmra.mxu2 %vm212_vm6, %v2641_v19 }
 0x298   :  { %2167 = vmatmul.msk.f32.vlgmr.msrb.gmra.mxu3 %vm212_vm6, %v2630_v15 }
 0x29c   :  { %v316_v25 = vpop.permute.xlu1 %315 }
 0x29d   :  { %2168 = vmatpush.xpose.msk.msrb.mxu0 %vm212_vm6, %v316_v25 }
 0x2a0   :  { %2169 = vmatmul.msk.f32.vlgmr.msrb.gmra.mxu0 %vm212_vm6, %v2634_v16 }
 0x2a3   :  { %v368_v26 = vpop.permute.xlu0 %367 }
 0x2a4   :  { %2172 = vmatpush.xpose.msk.msra.mxu3 %vm212_vm6, %v368_v26 }
 0x2a7   :  { %2173 = vmatmul.msk.f32.vlgmr.msra.gmra.mxu3 %vm212_vm6, %v207_v17 }
 0x2ac   :  { %v394_v27 = vpop.permute.xlu0 %393 }
 0x2ad   :  { %2174 = vmatpush.xpose.msk.msrb.mxu2 %vm212_vm6, %v394_v27 }
 0x2b0   :  { %2175 = vmatmul.msk.f32.vlgmr.msrb.gmra.mxu2 %vm212_vm6, %v2638_v18 }
 0x2bf   :  { %v260_v28 = vpop.f32.mrf.mxu3 }
 0x2c0   :  { %v234_v29 = vpop.f32.mrf.mxu2  ;;  %v420_v30 = vmul.f32 0.35355338, %v260_v28 }
 0x2c1   :  { %v419_v31 = vmul.f32 0.35355338, %v234_v29 }
 0x2c2   :  { %v430_v34 = vsel %vm212_vm6, %v420_v30, -inf }
 0x2c3   :  { %431 = vmax.xlane.f32.xlu0 %v430_v34  ;;  %v427_v35 = vsel %vm212_vm6, %v419_v31, -inf }
 0x2c4   :  { %428 = vmax.xlane.f32.xlu1 %v427_v35 }
 0x2fa   :  { %v286_v36 = vpop.f32.mrf.mxu2 }
 0x2fb   :  { %v421_v37 = vmul.f32 0.35355338, %v286_v36 }
 0x2fd   :  { %v433_v38 = vsel %vm212_vm6, %v421_v37, -inf }
 0x2fe   :  { %434 = vmax.xlane.f32.xlu2 %v433_v38 }
 0x31a   :  { %v364_v39 = vpop.f32.mrf.mxu2 }
 0x31b   :  { %v312_v40 = vpop.f32.mrf.mxu3  ;;  %v424_v41 = vmul.f32 0.35355338, %v364_v39 }
 0x31c   :  { %v422_v42 = vmul.f32 0.35355338, %v312_v40 }
 0x31d   :  { %v338_v43 = vpop.f32.mrf.mxu0  ;;  %v442_v44 = vsel %vm212_vm6, %v424_v41, -inf }
 0x31e   :  { %v423_v45 = vmul.f32 0.35355338, %v338_v43  ;;  %v436_v46 = vsel %vm212_vm6, %v422_v42, -inf  ;;  %443 = vmax.xlane.f32.xlu2 %v442_v44 }
 0x31f   :  { %437 = vmax.xlane.f32.xlu0 %v436_v46 }
 0x320   :  { %v439_v47 = vsel %vm212_vm6, %v423_v45, -inf }
 0x321   :  { %440 = vmax.xlane.f32.xlu1 %v439_v47 }
 0x32a   :  { %v390_v62 = vpop.f32.mrf.mxu3 }
 0x32b   :  { %v425_v63 = vmul.f32 0.35355338, %v390_v62 }
 0x32d   :  { %v445_v0 = vsel %vm212_vm6, %v425_v63, -inf }
 0x333   :  { %2319 = vrot.lane.b32.xlu0 %v2318_v48, %s2537_s21  ;;  %v416_v49 = vpop.f32.mrf.mxu2 }
 0x334   :  { %v426_v50 = vmul.f32 0.35355338, %v416_v49 }
 0x336   :  { %v432_v51 = vpop.xlane.xlu0 %431  ;;  %v448_v52 = vsel %vm212_vm6, %v426_v50, -inf }
 0x337   :  { %v452_v53 = vsub.f32 %v420_v30, %v432_v51  ;;  %v429_v54 = vpop.xlane.xlu1 %428  ;;  %449 = vmax.xlane.f32.xlu1 %v448_v52 }
 0x338   :  { %v451_v55 = vsub.f32 %v419_v31, %v429_v54 }
 0x339   :  { %v461_v56 = vmul.f32 1.442695, %v452_v53 }
 0x33a   :  { %v459_v57 = vmul.f32 1.442695, %v451_v55 }
 0x33b   :  { %2391 = vpow2.f32 %v461_v56 }
 0x33c   :  { %2393 = vpow2.f32 %v459_v57 }
 0x341   :  { %v2679_v58 = vpop.eup %2391 }
 0x342   :  { %v2681_v59 = vpop.eup %2393  ;;  %v478_v60 = vsel %vm212_vm6, %v2679_v58, 0.0 }
 0x343   :  { %v475_v61 = vsel %vm212_vm6, %v2681_v59, 0.0  ;;  %479 = vadd.xlane.f32.xlu1 %v478_v60 }
 0x344   :  { %476 = vadd.xlane.f32.xlu2 %v475_v61 }
 0x34c   :  { %446 = vmax.xlane.f32.xlu2 %v445_v0 }
 0x364   :  { %2314 = vrot.lane.b32.xlu2 %v2313_v2, %s2537_s21 }
 0x371   :  { %v435_v3 = vpop.xlane.xlu2 %434 }
 0x372   :  { %v453_v9 = vsub.f32 %v421_v37, %v435_v3 }
 0x374   :  { %v463_v10 = vmul.f32 1.442695, %v453_v9 }
 0x376   :  { %2395 = vpow2.f32 %v463_v10 }
 0x37c   :  { %v2691_v12 = vpop.eup %2395 }
 0x37d   :  { %v481_v13 = vsel %vm212_vm6, %v2691_v12, 0.0 }
 0x37e   :  { %482 = vadd.xlane.f32.xlu0 %v481_v13 }
 0x391   :  { %v444_v17 = vpop.xlane.xlu2 %443 }
 0x392   :  { %v438_v20 = vpop.xlane.xlu0 %437  ;;  %v456_v21 = vsub.f32 %v424_v41, %v444_v17 }
 0x393   :  { %v454_v22 = vsub.f32 %v422_v42, %v438_v20 }
 0x394   :  { %v469_v23 = vmul.f32 1.442695, %v456_v21  ;;  %v441_v24 = vpop.xlane.xlu1 %440 }
 0x395   :  { %v465_v25 = vmul.f32 1.442695, %v454_v22  ;;  %v455_v11 = vsub.f32 %v423_v45, %v441_v24  ;;  %v2323_v24 = vpack.i.bf16 %v2630_v15, %v2634_v16 }
 0x396   :  { %2397 = vpow2.f32 %v469_v23 }
 0x397   :  { %2399 = vpow2.f32 %v465_v25  ;;  %v467_v14 = vmul.f32 1.442695, %v455_v11 }
 0x399   :  { %2401 = vpow2.f32 %v467_v14 }
 0x39c   :  { %v2695_v26 = vpop.eup %2397 }
 0x39d   :  { %v2697_v27 = vpop.eup %2399  ;;  %v490_v28 = vsel %vm212_vm6, %v2695_v26, 0.0 }
 0x39e   :  { %v484_v29 = vsel %vm212_vm6, %v2697_v27, 0.0  ;;  %491 = vadd.xlane.f32.xlu0 %v490_v28 }
 0x39f   :  { %v2703_v30 = vpop.eup %2401  ;;  %485 = vadd.xlane.f32.xlu1 %v484_v29 }
 0x3a0   :  { %v487_v31 = vsel %vm212_vm6, %v2703_v30, 0.0 }
 0x3a1   :  { %488 = vadd.xlane.f32.xlu2 %v487_v31 }
 0x3a5   :  { %v2320_v34 = vpop.permute.xlu0 %2319 }
 0x3a6   :  { %v2321_v35 = vunpack.i.l.bf16 %v2320_v34  ;;  %v2322_v22 = vunpack.i.h.bf16 %v2320_v34 }
 0x3a8   :  { %666 = vmatpush.msra.mxu2 %v2321_v35 }
 0x3aa   :  { %v450_v36 = vpop.xlane.xlu1 %449 }
 0x3ab   :  { %v458_v37 = vsub.f32 %v426_v50, %v450_v36 }
 0x3ad   :  { %v473_v38 = vmul.f32 1.442695, %v458_v37 }
 0x3af   :  { %2403 = vpow2.f32 %v473_v38 }
 0x3b5   :  { %v2707_v39 = vpop.eup %2403 }
 0x3b6   :  { %v496_v40 = vsel %vm212_vm6, %v2707_v39, 0.0  ;;  %v480_v41 = vpop.xlane.xlu1 %479 }
 0x3b7   :  { %497 = vadd.xlane.f32.xlu1 %v496_v40  ;;  %2405 = vrcp.f32 %v480_v41  ;;  %v477_v42 = vpop.xlane.xlu2 %476  ;;  %v523_v50 = vand.u32 2147483647, %v480_v41  ;;  %v525_v51 = vand.u32 2147483648, %v480_v41  ;;  %vm519_vm9 = vweird.f32 %v480_v41 }
 0x3b8   :  { %2407 = vrcp.f32 %v477_v42  ;;  %v510_v54 = vand.u32 2147483648, %v477_v42  ;;  %v508_v57 = vand.u32 2147483647, %v477_v42  ;;  %vm504_vm11 = vweird.f32 %v477_v42 }
 0x3b9   :  { %749 = vrot.lane.b32.xlu2 %v2641_v19, %s2537_s21  ;;  %v526_v19 = vor.u32 1.1754944e-38, %v525_v51  ;;  %vm524_vm12 = vcmp.eq.f32.partialorder %v523_v50, 8.507059e+37 }
 0x3ba   :  { %vm509_vm14 = vcmp.eq.f32.partialorder %v508_v57, 8.507059e+37 }
 0x3bd   :  { %v2406_v43 = vpop.eup %2405 }
 0x3be   :  { %v2408_v44 = vpop.eup %2407  ;;  %v515_v45 = vmul.f32 %v2406_v43, %v480_v41  ;;  %vm520_vm7 = vweird.f32 %v2406_v43 }
 0x3bf   :  { %v500_v46 = vmul.f32 %v2408_v44, %v477_v42  ;;  %v447_v47 = vpop.xlane.xlu2 %446  ;;  %vm505_vm8 = vweird.f32 %v2408_v44  ;;  %vm521_vm10 = vmor %vm519_vm9, %vm520_vm7 }
 0x3c0   :  { %v516_v48 = vsub.f32 1.0, %v515_v45  ;;  %v457_v49 = vsub.f32 %v425_v63, %v447_v47  ;;  %vm506_vm13 = vmor %vm504_vm11, %vm505_vm8  ;;  %v511_v63 = vor.u32 1.1754944e-38, %v510_v54 }
 0x3c1   :  { %v501_v52 = vsub.f32 1.0, %v500_v46  ;;  %2329 = vrot.lane.b32.xlu2 %v2588_v32, %s2544_s25 }
 0x3c2   :  { %v517_v53 = vmul.f32 %v2406_v43, %v516_v48  ;;  %v471_v55 = vmul.f32 1.442695, %v457_v49 }
 0x3c3   :  { %v502_v56 = vmul.f32 %v2408_v44, %v501_v52 }
 0x3c4   :  { %v518_v60 = vadd.f32 %v2406_v43, %v517_v53  ;;  %2409 = vpow2.f32 %v471_v55 }
 0x3c5   :  { %v503_v61 = vadd.f32 %v2408_v44, %v502_v56 }
 0x3c6   :  { %v522_v62 = vsel %vm521_vm10, %v2406_v43, %v518_v60 }
 0x3c7   :  { %v527_v0 = vsel %vm524_vm12, %v526_v19, %v522_v62  ;;  %v507_v2 = vsel %vm506_vm13, %v2408_v44, %v503_v61  ;;  %v2315_v3 = vpop.permute.xlu2 %2314 }
 0x3c8   :  { %v512_v9 = vsel %vm509_vm14, %v511_v63, %v507_v2  ;;  %v2317_v10 = vunpack.i.h.bf16 %v2315_v3  ;;  %v2316_v13 = vunpack.i.l.bf16 %v2315_v3  ;;  %v528_v17 = vmul.f32 %v2679_v58, %v527_v0 }
 0x3c9   :  { %v513_v20 = vmul.f32 %v2681_v59, %v512_v9 }
 0x3ca   :  { %v2715_v21 = vpop.eup %2409  ;;  %640 = vmatpush.msra.mxu0 %v2317_v10  ;;  %692 = vmatpush.msrb.mxu3 %v2316_v13 }
 0x3cb   :  { %2176 = vmatmul.msk.f32.vlgmr.msra.gmra.mxu0 %vm212_vm6, %v513_v20  ;;  %2177 = vmatmul.msk.f32.vlgmr.msra.gmra.mxu2 %vm212_vm6, %v528_v17  ;;  %v493_v23 = vsel %vm212_vm6, %v2715_v21, 0.0 }
 0x3cc   :  { %796 = vmatpush.msra.mxu3 %v2322_v22  ;;  %494 = vadd.xlane.f32.xlu0 %v493_v23 }
 0x3d0   :  { %2324 = vrot.lane.b32.xlu1 %v2323_v24, %s2537_s21 }
 0x3d8   :  { %2334 = vrot.lane.b32.xlu1 %v2590_v33, %s2544_s25 }
 0x3e0   :  { %801 = vrot.lane.b32.xlu0 %v2638_v18, %s2537_s21 }
 0x3f1   :  { %v483_v58 = vpop.xlane.xlu0 %482 }
 0x3f2   :  { %2411 = vrcp.f32 %v483_v58  ;;  %v540_v14 = vand.u32 2147483648, %v483_v58  ;;  %v538_v29 = vand.u32 2147483647, %v483_v58  ;;  %vm534_vm2 = vweird.f32 %v483_v58 }
 0x3f4   :  { %v541_v34 = vor.u32 1.1754944e-38, %v540_v14  ;;  %vm539_vm4 = vcmp.eq.f32.partialorder %v538_v29, 8.507059e+37 }
 0x3f8   :  { %v2412_v59 = vpop.eup %2411 }
 0x3f9   :  { %v530_v25 = vmul.f32 %v2412_v59, %v483_v58  ;;  %vm535_vm15 = vweird.f32 %v2412_v59 }
 0x3fa   :  { %vm536_vm3 = vmor %vm534_vm2, %vm535_vm15 }
 0x3fb   :  { %v531_v11 = vsub.f32 1.0, %v530_v25 }
 0x3fd   :  { %v532_v28 = vmul.f32 %v2412_v59, %v531_v11 }
 0x3ff   :  { %v533_v31 = vadd.f32 %v2412_v59, %v532_v28 }
 0x401   :  { %v537_v35 = vsel %vm536_vm3, %v2412_v59, %v533_v31 }
 0x402   :  { %v542_v15 = vsel %vm539_vm4, %v541_v34, %v537_v35 }
 0x403   :  { %v543_v16 = vmul.f32 %v2691_v12, %v542_v15 }
 0x405   :  { %2178 = vmatmul.msk.f32.vlgmr.msrb.gmra.mxu3 %vm212_vm6, %v543_v16 }
 0x411   :  { %v492_v18 = vpop.xlane.xlu0 %491 }
 0x412   :  { %2413 = vrcp.f32 %v492_v18  ;;  %v585_v41 = vand.u32 2147483648, %v492_v18  ;;  %v583_v44 = vand.u32 2147483647, %v492_v18  ;;  %vm579_vm7 = vweird.f32 %v492_v18  ;;  %v486_v47 = vpop.xlane.xlu1 %485 }
 0x413   :  { %2415 = vrcp.f32 %v486_v47  ;;  %vm549_vm12 = vweird.f32 %v486_v47  ;;  %v555_v32 = vand.u32 2147483648, %v486_v47  ;;  %v553_v63 = vand.u32 2147483647, %v486_v47 }
 0x414   :  { %v489_v36 = vpop.xlane.xlu2 %488  ;;  %v586_v46 = vor.u32 1.1754944e-38, %v585_v41  ;;  %vm584_vm9 = vcmp.eq.f32.partialorder %v583_v44, 8.507059e+37 }
 0x415   :  { %2417 = vrcp.f32 %v489_v36  ;;  %v570_v62 = vand.u32 2147483648, %v489_v36  ;;  %vm564_vm14 = vweird.f32 %v489_v36  ;;  %v568_v0 = vand.u32 2147483647, %v489_v36 }
 0x416   :  { %v556_v10 = vor.u32 1.1754944e-38, %v555_v32  ;;  %vm554_vm2 = vcmp.eq.f32.partialorder %v553_v63, 8.507059e+37 }
 0x417   :  { %v571_v13 = vor.u32 1.1754944e-38, %v570_v62  ;;  %vm569_vm3 = vcmp.eq.f32.partialorder %v568_v0, 8.507059e+37 }
 0x418   :  { %v2414_v37 = vpop.eup %2413 }
 0x419   :  { %v575_v38 = vmul.f32 %v2414_v37, %v492_v18  ;;  %vm580_vm5 = vweird.f32 %v2414_v37  ;;  %v2416_v50 = vpop.eup %2415 }
 0x41a   :  { %vm581_vm8 = vmor %vm579_vm7, %vm580_vm5  ;;  %v545_v52 = vmul.f32 %v2416_v50, %v486_v47  ;;  %vm550_vm10 = vweird.f32 %v2416_v50 }
 0x41b   :  { %v576_v40 = vsub.f32 1.0, %v575_v38  ;;  %v2418_v51 = vpop.eup %2417  ;;  %vm2734_vm13 = vmor %vm549_vm12, %vm550_vm10 }
 0x41c   :  { %v750_v42 = vpop.permute.xlu2 %749  ;;  %v560_v53 = vmul.f32 %v2418_v51, %v489_v36  ;;  %v546_v55 = vsub.f32 1.0, %v545_v52  ;;  %vm565_vm11 = vweird.f32 %v2418_v51 }
 0x41d   :  { %v577_v43 = vmul.f32 %v2414_v37, %v576_v40  ;;  %770 = vmatpush.msrb.mxu2 %v750_v42  ;;  %vm566_vm15 = vmor %vm564_vm14, %vm565_vm11 }
 0x41e   :  { %v561_v56 = vsub.f32 1.0, %v560_v53 }
 0x41f   :  { %v578_v45 = vadd.f32 %v2414_v37, %v577_v43 }
 0x420   :  { %v562_v57 = vmul.f32 %v2418_v51, %v561_v56 }
 0x421   :  { %v582_v12 = vsel %vm581_vm8, %v2414_v37, %v578_v45 }
 0x422   :  { %v587_v48 = vsel %vm584_vm9, %v586_v46, %v582_v12  ;;  %v563_v61 = vadd.f32 %v2418_v51, %v562_v57 }
 0x423   :  { %v588_v49 = vmul.f32 %v2695_v26, %v587_v48  ;;  %v547_v26 = vmul.f32 %v2416_v50, %v546_v55 }
 0x424   :  { %v567_v3 = vsel %vm566_vm15, %v2418_v51, %v563_v61 }
 0x425   :  { %2181 = vmatmul.msk.f32.vlgmr.msrb.gmra.mxu2 %vm212_vm6, %v588_v49  ;;  %v548_v19 = vadd.f32 %v2416_v50, %v547_v26  ;;  %v572_v22 = vsel %vm569_vm3, %v571_v13, %v567_v3 }
 0x426   :  { %v573_v14 = vmul.f32 %v2703_v30, %v572_v22 }
 0x427   :  { %v552_v9 = vsel %vm2734_vm13, %v2416_v50, %v548_v19  ;;  %v2330_v50 = vpop.permute.xlu2 %2329  ;;  %vm855_vm13 = vcmask 195584  }
 0x428   :  { %v557_v23 = vsel %vm554_vm2, %v556_v10, %v552_v9  ;;  %v2332_v51 = vunpack.i.h.bf16 %v2330_v50  ;;  %v2331_v52 = vunpack.i.l.bf16 %v2330_v50  ;;  %v858_v9 = vperm.slane %v165_v8, 1 }
 0x429   :  { %v558_v11 = vmul.f32 %v2697_v27, %v557_v23 }
 0x42a   :  { %v498_v54 = vpop.xlane.xlu1 %497 }
 0x42b   :  { %2419 = vrcp.f32 %v498_v54  ;;  %v615_v34 = vand.u32 2147483648, %v498_v54  ;;  %vm609_vm5 = vweird.f32 %v498_v54  ;;  %v613_v15 = vand.u32 2147483647, %v498_v54 }
 0x42d   :  { %v616_v36 = vor.u32 1.1754944e-38, %v615_v34  ;;  %vm614_vm10 = vcmp.eq.f32.partialorder %v613_v15, 8.507059e+37 }
 0x431   :  { %v2420_v60 = vpop.eup %2419 }
 0x432   :  { %v605_v2 = vmul.f32 %v2420_v60, %v498_v54  ;;  %vm610_vm4 = vweird.f32 %v2420_v60 }
 0x433   :  { %vm611_vm7 = vmor %vm609_vm5, %vm610_vm4 }
 0x434   :  { %v606_v20 = vsub.f32 1.0, %v605_v2 }
 0x436   :  { %v607_v25 = vmul.f32 %v2420_v60, %v606_v20 }
 0x438   :  { %v608_v31 = vadd.f32 %v2420_v60, %v607_v25 }
 0x43a   :  { %v612_v30 = vsel %vm611_vm7, %v2420_v60, %v608_v31 }
 0x43b   :  { %v617_v40 = vsel %vm614_vm10, %v616_v36, %v612_v30 }
 0x43c   :  { %v618_v45 = vmul.f32 %v2707_v39, %v617_v40  ;;  %v2286_v40 = vld [vmem:[#allocation4 + $0x38] sm:$0xff]  }
 0x43f   :  { %v495_v17 = vpop.xlane.xlu0 %494 }
 0x440   :  { %2421 = vrcp.f32 %v495_v17  ;;  %v600_v16 = vand.u32 2147483648, %v495_v17  ;;  %v598_v27 = vand.u32 2147483647, %v495_v17  ;;  %vm594_vm9 = vweird.f32 %v495_v17 }
 0x442   :  { %v2325_v24 = vpop.permute.xlu1 %2324  ;;  %v601_v38 = vor.u32 1.1754944e-38, %v600_v16  ;;  %vm599_vm12 = vcmp.eq.f32.partialorder %v598_v27, 8.507059e+37 }
 0x443   :  { %v2326_v58 = vunpack.i.l.bf16 %v2325_v24  ;;  %v2327_v59 = vunpack.i.h.bf16 %v2325_v24 }
 0x445   :  { %718 = vmatpush.msrb.mxu1 %v2327_v59  ;;  %744 = vmatpush.msrb.mxu0 %v2326_v58  ;;  %v2547_v59 = vmov 32.0  }
 0x446   :  { %v2422_v28 = vpop.eup %2421  ;;  %2179 = vmatmul.msk.f32.vlgmr.msrb.gmra.mxu1 %vm212_vm6, %v558_v11  ;;  %2180 = vmatmul.msk.f32.vlgmr.msrb.gmra.mxu0 %vm212_vm6, %v573_v14  ;;  %2423 = vrcp.f32 %v2547_v59 }
 0x447   :  { %v590_v29 = vmul.f32 %v2422_v28, %v495_v17  ;;  %vm595_vm8 = vweird.f32 %v2422_v28  ;;  %893 = vmatpush.msra.mxu0 %v2331_v52 }
 0x448   :  { %vm596_vm11 = vmor %vm594_vm9, %vm595_vm8  ;;  %v642_v47 = vpop.f32.mrf.mxu0  ;;  %vm1016_vm8 = vcmask 523264  }
 0x449   :  { %v591_v35 = vsub.f32 1.0, %v590_v29  ;;  %894 = vmatpush.msra.mxu0 %v2332_v51 }
 0x44a   :  { %v2335_v54 = vpop.permute.xlu1 %2334 }
 0x44b   :  { %v592_v18 = vmul.f32 %v2422_v28, %v591_v35  ;;  %v2337_v55 = vunpack.i.h.bf16 %v2335_v54  ;;  %v2336_v56 = vunpack.i.l.bf16 %v2335_v54 }
 0x44c   :  { %v2424_v25 = vpop.eup %2423 }
 0x44d   :  { %v593_v37 = vadd.f32 %v2422_v28, %v592_v18  ;;  %895 = vmatpush.msra.mxu0 %v2336_v56  ;;  %v915_v11 = vmul.f32 32.0, %v2424_v25  ;;  %vm919_vm14 = vweird.f32 %v2424_v25 }
 0x44e   :  { %v668_v12 = vpop.f32.mrf.mxu2 }
 0x44f   :  { %v597_v41 = vsel %vm596_vm11, %v2422_v28, %v593_v37  ;;  %896 = vmatpush.msra.mxu0 %v2337_v55  ;;  %v916_v7 = vsub.f32 1.0, %v915_v11  ;;  %v2287_v28 = vld [vmem:[#allocation4 + $0x40] sm:$0xff]  }
 0x450   :  { %v602_v42 = vsel %vm599_vm12, %v601_v38, %v597_v41  ;;  %v2243_v29 = vunpack.c.h.bf16 %v2287_v28  ;;  %v2238_v41 = vunpack.c.l.bf16 %v2286_v40 }
 0x451   :  { %v603_v43 = vmul.f32 %v2715_v21, %v602_v42  ;;  %v917_v8 = vmul.f32 %v2424_v25, %v916_v7  ;;  %v2239_v42 = vunpack.c.h.bf16 %v2286_v40 }
 0x452   :  { %v802_v44 = vpop.permute.xlu0 %801 }
 0x453   :  { %2182 = vmatmul.msk.f32.vlgmr.msra.gmra.mxu3 %vm212_vm6, %v603_v43  ;;  %822 = vmatpush.msra.mxu1 %v802_v44  ;;  %v918_v14 = vadd.f32 %v2424_v25, %v917_v8  ;;  %v2343_v43 = vpack.i.bf16 %v2238_v41, %v2239_v42 }
 0x454   :  { %2183 = vmatmul.msk.f32.vlgmr.msra.gmra.mxu1 %vm212_vm6, %v618_v45 }
 0x455   :  { %v2768_v31 = vsel %vm919_vm14, %v2424_v25, %v918_v14  ;;  %v965_v14 = vld [vmem:[#allocation4 + $0x58] sm:$0x8] }
 0x488   :  { %v694_v46 = vpop.f32.mrf.mxu3 }
 0x489   :  { %829 = vrot.lane.b32.xlu0 %v694_v46, %s2535_s18 }
 0x4a8   :  { %v772_v21 = vpop.f32.mrf.mxu2 }
 0x4c3   :  { %v720_v48 = vpop.f32.mrf.mxu1  ;;  %v746_v49 = vpop.f32.mrf.mxu0 }
 0x4c4   :  { %831 = vrot.lane.b32.xlu1 %v720_v48, %s2535_s18  ;;  %837 = vrot.lane.b32.xlu2 %v746_v49, %s2545_s26  ;;  %v2289_v49 = vld [vmem:[#allocation4 + $0x50] sm:$0xff]  }
 0x4c5   :  { %v2250_v50 = vunpack.c.l.bf16 %v2289_v49 }
 0x4cc   :  { %839 = vrot.lane.b32.xlu2 %v772_v21, %s2545_s26  ;;  %v2288_v21 = vld [vmem:[#allocation4 + $0x48] sm:$0xff]  }
 0x4cd   :  { %v2247_v52 = vunpack.c.h.bf16 %v2288_v21  ;;  %v2246_v54 = vunpack.c.l.bf16 %v2288_v21 }
 0x4d1   :  { %v824_v53 = vpop.f32.mrf.mxu1 }
 0x4d6   :  { %v798_v39 = vpop.f32.mrf.mxu3 }
 0x4d7   :  { %845 = vrot.lane.b32.xlu0 %v798_v39, %s2546_s27  ;;  %v2251_v39 = vunpack.c.h.bf16 %v2289_v49 }
 0x4d9   :  { %1031 = vmatpush.msrb.mxu3 %v2251_v39 }
 0x4db   :  { %1032 = vmatpush.msrb.mxu3 %v2250_v50  ;;  %v2793_v50 = vld [vmem:[#allocation4 + $0x68] sm:$0xff]  }
 0x4dd   :  { %1033 = vmatpush.msrb.mxu3 %v2247_v52  ;;  %v2258_v52 = vunpack.c.l.bf16 %v2793_v50 }
 0x4df   :  { %847 = vrot.lane.b32.xlu0 %v824_v53, %s2546_s27  ;;  %1034 = vmatpush.msrb.mxu3 %v2246_v54 }
 0x4e1   :  { %1035 = vmatpush.msrb.mxu3 %v2243_v29 }
 0x4fb   :  { %v830_v26 = vpop.permute.xlu0 %829 }
 0x4fc   :  { %v851_v60 = vsel %vm212_vm6, %v642_v47, %v830_v26 }
 0x51e   :  { %v838_v57 = vpop.permute.xlu2 %837 }
 0x51f   :  { %v853_v19 = vsel %vm52_vm0, %v851_v60, %v838_v57  ;;  %v906_v57 = vld [vmem:[#allocation4 + $0x58] sm:$0x2] }
 0x526   :  { %v840_v63 = vpop.permute.xlu2 %839 }
 0x536   :  { %v832_v62 = vpop.permute.xlu1 %831 }
 0x537   :  { %v852_v33 = vsel %vm212_vm6, %v668_v12, %v832_v62 }
 0x538   :  { %v854_v2 = vsel %vm52_vm0, %v852_v33, %v840_v63 }
 0x549   :  { %v846_v61 = vpop.permute.xlu0 %845 }
 0x54a   :  { %v856_v32 = vsel %vm855_vm13, %v853_v19, %v846_v61  ;;  %v907_v61 = vunpack.c.l.bf16 %v906_v57 }
 0x54b   :  { %2184 = vmatmul.msk.f32.vlgmr.msra.gmra.mxu0 %vm82_vm1, %v856_v32 }
 0x551   :  { %v848_v0 = vpop.permute.xlu0 %847 }
 0x552   :  { %v857_v3 = vsel %vm855_vm13, %v854_v2, %v848_v0  ;;  %v959_v2 = vperm.slane %v907_v61, 2 }
 0x553   :  { %2185 = vmatmul.msk.f32.gmra.mxu0 %vm82_vm1, %v857_v3 }
 0x5c8   :  { %v898_v10 = vpop.f32.mrf.mxu0 }
 0x5c9   :  { %v899_v13 = vadd.f32 %v898_v10, %v858_v9 }
 0x5cb   :  { %v904_v17 = vadd.f32 %v899_v13, %v2593_v1  ;;  %v2242_v1 = vunpack.c.l.bf16 %v2287_v28  ;;  %v966_v28 = vunpack.c.l.bf16 %v965_v14 }
 0x5cd   :  { %v908_v20 = vsel %vm82_vm1, %v904_v17, 0.0  ;;  %v2338_v34 = vpack.i.bf16 %v2242_v1, %v2243_v29  ;;  %1036 = vmatpush.msrb.mxu3 %v2242_v1  ;;  %v967_v1 = vperm.slane %v966_v28, 6 }
 0x5ce   :  { %909 = vadd.xlane.f32.xlu1 %v908_v20  ;;  %v962_v20 = vperm.slane %v907_v61, 3 }
 0x5cf   :  { %1037 = vmatpush.msrb.mxu3 %v2239_v42 }
 0x5d0   :  { %v901_v22 = vpop.f32.mrf.mxu0 }
 0x5d1   :  { %v902_v23 = vadd.f32 %v901_v22, %v858_v9  ;;  %1038 = vmatpush.msrb.mxu3 %v2238_v41 }
 0x5d3   :  { %v905_v24 = vadd.f32 %v902_v23, %v2597_v4 }
 0x5d5   :  { %v911_v58 = vsel %vm82_vm1, %v905_v24, 0.0 }
 0x5d6   :  { %912 = vadd.xlane.f32.xlu2 %v911_v58 }
 0x5ee   :  { %2339 = vrot.lane.b32.xlu2 %v2338_v34, %s2543_s24 }
 0x641   :  { %v910_v35 = vpop.xlane.xlu1 %909 }
 0x642   :  { %v921_v4 = vmul.f32 %v2768_v31, %v910_v35 }
 0x644   :  { %v923_v15 = vsub.f32 %v904_v17, %v921_v4 }
 0x646   :  { %v925_v16 = vmul.f32 %v923_v15, %v923_v15 }
 0x648   :  { %v927_v18 = vsel %vm82_vm1, %v925_v16, 0.0 }
 0x649   :  { %928 = vadd.xlane.f32.xlu0 %v927_v18  ;;  %v913_v27 = vpop.xlane.xlu2 %912  ;;  %v1015_v18 = vperm.slane %v966_v28, 7 }
 0x64a   :  { %v922_v30 = vmul.f32 %v2768_v31, %v913_v27 }
 0x64c   :  { %v2774_v36 = vsub.f32 %v905_v24, %v922_v30 }
 0x64e   :  { %v926_v37 = vmul.f32 %v2774_v36, %v2774_v36 }
 0x650   :  { %v930_v38 = vsel %vm82_vm1, %v926_v37, 0.0 }
 0x651   :  { %931 = vadd.xlane.f32.xlu1 %v930_v38  ;;  %v2340_v44 = vpop.permute.xlu2 %2339 }
 0x652   :  { %v2341_v45 = vunpack.i.l.bf16 %v2340_v44  ;;  %v2342_v46 = vunpack.i.h.bf16 %v2340_v44 }
 0x654   :  { %1002 = vmatpush.msra.mxu2 %v2341_v45 }
 0x656   :  { %1003 = vmatpush.msra.mxu2 %v2342_v46 }
 0x65d   :  { %2344 = vrot.lane.b32.xlu0 %v2343_v43, %s2543_s24 }
 0x6bc   :  { %v929_v47 = vpop.xlane.xlu0 %928 }
 0x6bd   :  { %v933_v12 = vmul.f32 %v929_v47, %v2768_v31 }
 0x6bf   :  { %v935_v48 = vadd.f32 1e-05, %v933_v12 }
 0x6c1   :  { %2425 = vrsqrt.f32 %v935_v48  ;;  %vm943_vm2 = vweird.f32 %v935_v48 }
 0x6c4   :  { %v932_v51 = vpop.xlane.xlu1 %931 }
 0x6c5   :  { %v934_v53 = vmul.f32 %v932_v51, %v2768_v31  ;;  %v2259_v51 = vunpack.c.h.bf16 %v2793_v50 }
 0x6c7   :  { %v2426_v55 = vpop.eup %2425  ;;  %v936_v56 = vadd.f32 1e-05, %v934_v53  ;;  %1145 = vmatpush.msrb.mxu1 %v2259_v51  ;;  %v2799_v53 = vld [vmem:[#allocation4 + $0x60] sm:$0xff]  }
 0x6c8   :  { %v938_v26 = vmul.f32 %v2426_v55, %v935_v48  ;;  %vm944_vm15 = vweird.f32 %v2426_v55  ;;  %v2255_v54 = vunpack.c.h.bf16 %v2799_v53 }
 0x6c9   :  { %2427 = vrsqrt.f32 %v936_v56  ;;  %vm945_vm3 = vmor %vm943_vm2, %vm944_vm15  ;;  %vm953_vm5 = vweird.f32 %v936_v56  ;;  %1146 = vmatpush.msrb.mxu1 %v2258_v52 }
 0x6ca   :  { %v939_v60 = vmul.f32 %v2426_v55, %v938_v26 }
 0x6cb   :  { %1147 = vmatpush.msrb.mxu1 %v2255_v54 }
 0x6cc   :  { %v940_v19 = vmul.f32 0.5, %v939_v60 }
 0x6ce   :  { %v941_v32 = vsub.f32 1.5, %v940_v19 }
 0x6cf   :  { %v2428_v62 = vpop.eup %2427  ;;  %v2345_v33 = vpop.permute.xlu0 %2344 }
 0x6d0   :  { %v942_v63 = vmul.f32 %v2426_v55, %v941_v32  ;;  %v948_v0 = vmul.f32 %v2428_v62, %v936_v56  ;;  %v2347_v3 = vunpack.i.h.bf16 %v2345_v33  ;;  %v2346_v9 = vunpack.i.l.bf16 %v2345_v33  ;;  %v1048_v33 = vld [vmem:[#allocation4 + $0x58] sm:$0x4] }
 0x6d1   :  { %vm954_vm4 = vweird.f32 %v2428_v62 }
 0x6d2   :  { %v946_v10 = vsel %vm945_vm3, %v2426_v55, %v942_v63  ;;  %v949_v13 = vmul.f32 %v2428_v62, %v948_v0  ;;  %1004 = vmatpush.msra.mxu2 %v2346_v9  ;;  %vm955_vm7 = vmor %vm953_vm5, %vm954_vm4  ;;  %v2254_v55 = vunpack.c.l.bf16 %v2799_v53 }
 0x6d3   :  { %v957_v17 = vmul.f32 %v946_v10, %v923_v15 }
 0x6d4   :  { %v950_v22 = vmul.f32 0.5, %v949_v13  ;;  %1005 = vmatpush.msra.mxu2 %v2347_v3  ;;  %1148 = vmatpush.msrb.mxu1 %v2254_v55 }
 0x6d5   :  { %v960_v23 = vmul.f32 %v959_v2, %v957_v17 }
 0x6d6   :  { %v951_v24 = vsub.f32 1.5, %v950_v22 }
 0x6d7   :  { %v963_v58 = vadd.f32 %v962_v20, %v960_v23 }
 0x6d8   :  { %v952_v59 = vmul.f32 %v2428_v62, %v951_v24 }
 0x6d9   :  { %2186 = vmatmul.msk.f32.vlgmr.msra.gmra.mxu2 %vm82_vm1, %v963_v58 }
 0x6da   :  { %v956_v25 = vsel %vm955_vm7, %v2428_v62, %v952_v59 }
 0x6db   :  { %v958_v11 = vmul.f32 %v956_v25, %v2774_v36 }
 0x6dd   :  { %v961_v7 = vmul.f32 %v959_v2, %v958_v11  ;;  %v1049_v2 = vunpack.c.l.bf16 %v1048_v33 }
 0x6df   :  { %v964_v8 = vadd.f32 %v962_v20, %v961_v7  ;;  %v1094_v17 = vperm.slane %v1049_v2, 4  ;;  %v1097_v24 = vperm.slane %v1049_v2, 5 }
 0x6e1   :  { %2187 = vmatmul.msk.f32.gmra.mxu2 %vm82_vm1, %v964_v8 }
 0x75c   :  { %v1007_v29 = vpop.f32.mrf.mxu2 }
 0x75d   :  { %v1008_v34 = vadd.f32 %v1007_v29, %v967_v1  ;;  %v2819_v29 = vld [vmem:[#allocation4 + $0x90] sm:$0x1] }
 0x75f   :  { %v1013_v35 = vmax.f32 %v1008_v34, 0.0  ;;  %v1125_v34 = vunpack.c.l.bf16 %v2819_v29 }
 0x761   :  { %2188 = vmatmul.msk.f32.vlgmr.msrb.gmra.mxu3 %vm1016_vm8, %v1013_v35  ;;  %v1126_v35 = vperm.slane %v1125_v34, 0 }
 0x764   :  { %v1010_v4 = vpop.f32.mrf.mxu2 }
 0x765   :  { %v1011_v15 = vadd.f32 %v1010_v4, %v967_v1 }
 0x767   :  { %v1014_v16 = vmax.f32 %v1011_v15, 0.0 }
 0x769   :  { %2189 = vmatmul.msk.f32.gmra.mxu3 %vm1016_vm8, %v1014_v16 }
 0x7e4   :  { %v1040_v27 = vpop.f32.mrf.mxu3 }
 0x7e5   :  { %v1041_v30 = vadd.f32 %v1040_v27, %v1015_v18 }
 0x7e7   :  { %v1046_v36 = vadd.f32 %v1041_v30, %v963_v58 }
 0x7e9   :  { %v1050_v37 = vsel %vm82_vm1, %v1046_v36, 0.0 }
 0x7ea   :  { %1051 = vadd.xlane.f32.xlu1 %v1050_v37 }
 0x7ec   :  { %v1043_v38 = vpop.f32.mrf.mxu3 }
 0x7ed   :  { %v1044_v40 = vadd.f32 %v1043_v38, %v1015_v18 }
 0x7ef   :  { %v1047_v41 = vadd.f32 %v1044_v40, %v964_v8 }
 0x7f1   :  { %v1053_v42 = vsel %vm82_vm1, %v1047_v41, 0.0 }
 0x7f2   :  { %1054 = vadd.xlane.f32.xlu1 %v1053_v42 }
 0x85d   :  { %v1052_v43 = vpop.xlane.xlu1 %1051 }
 0x85e   :  { %v1056_v44 = vmul.f32 %v1052_v43, %v2768_v31 }
 0x860   :  { %v1058_v45 = vsub.f32 %v1046_v36, %v1056_v44 }
 0x862   :  { %v1060_v46 = vmul.f32 %v1058_v45, %v1058_v45 }
 0x864   :  { %v1062_v47 = vsel %vm82_vm1, %v1060_v46, 0.0 }
 0x865   :  { %1063 = vadd.xlane.f32.xlu1 %v1062_v47  ;;  %v1055_v12 = vpop.xlane.xlu1 %1054 }
 0x866   :  { %v1057_v48 = vmul.f32 %v1055_v12, %v2768_v31 }
 0x868   :  { %v1059_v49 = vsub.f32 %v1047_v41, %v1057_v48 }
 0x86a   :  { %v1061_v21 = vmul.f32 %v1059_v49, %v1059_v49 }
 0x86c   :  { %v1065_v39 = vsel %vm82_vm1, %v1061_v21, 0.0 }
 0x86d   :  { %1066 = vadd.xlane.f32.xlu0 %v1065_v39 }
 0x8d8   :  { %v1064_v56 = vpop.xlane.xlu1 %1063 }
 0x8d9   :  { %v1068_v26 = vmul.f32 %v1064_v56, %v2768_v31 }
 0x8db   :  { %v1070_v57 = vadd.f32 1e-05, %v1068_v26 }
 0x8dd   :  { %2429 = vrsqrt.f32 %v1070_v57  ;;  %vm1078_vm10 = vweird.f32 %v1070_v57 }
 0x8e0   :  { %v1067_v60 = vpop.xlane.xlu0 %1066 }
 0x8e1   :  { %v1069_v19 = vmul.f32 %v1067_v60, %v2768_v31 }
 0x8e3   :  { %v2430_v61 = vpop.eup %2429  ;;  %v1071_v32 = vadd.f32 1e-05, %v1069_v19 }
 0x8e4   :  { %v1073_v62 = vmul.f32 %v2430_v61, %v1070_v57  ;;  %vm1079_vm9 = vweird.f32 %v2430_v61 }
 0x8e5   :  { %2431 = vrsqrt.f32 %v1071_v32  ;;  %vm1080_vm11 = vmor %vm1078_vm10, %vm1079_vm9  ;;  %vm1088_vm14 = vweird.f32 %v1071_v32 }
 0x8e6   :  { %v1074_v63 = vmul.f32 %v2430_v61, %v1073_v62 }
 0x8e8   :  { %v1075_v0 = vmul.f32 0.5, %v1074_v63 }
 0x8ea   :  { %v1076_v3 = vsub.f32 1.5, %v1075_v0 }
 0x8eb   :  { %v2432_v9 = vpop.eup %2431 }
 0x8ec   :  { %v1077_v10 = vmul.f32 %v2430_v61, %v1076_v3  ;;  %v1083_v13 = vmul.f32 %v2432_v9, %v1071_v32  ;;  %vm1089_vm12 = vweird.f32 %v2432_v9 }
 0x8ed   :  { %vm1090_vm15 = vmor %vm1088_vm14, %vm1089_vm12 }
 0x8ee   :  { %v1081_v20 = vsel %vm1080_vm11, %v2430_v61, %v1077_v10  ;;  %v1084_v22 = vmul.f32 %v2432_v9, %v1083_v13 }
 0x8ef   :  { %v1092_v23 = vmul.f32 %v1081_v20, %v1058_v45 }
 0x8f0   :  { %v1085_v58 = vmul.f32 0.5, %v1084_v22 }
 0x8f1   :  { %v1095_v59 = vmul.f32 %v1094_v17, %v1092_v23 }
 0x8f2   :  { %v1086_v25 = vsub.f32 1.5, %v1085_v58 }
 0x8f3   :  { %v2811_v11 = vadd.f32 %v1097_v24, %v1095_v59 }
 0x8f4   :  { %v1087_v7 = vmul.f32 %v2432_v9, %v1086_v25 }
 0x8f5   :  { %2190 = vmatmul.msk.f32.vlgmr.msrb.gmra.mxu1 %vm82_vm1, %v2811_v11 }
 0x8f6   :  { %v1091_v8 = vsel %vm1090_vm15, %v2432_v9, %v1087_v7 }
 0x8f7   :  { %v1093_v14 = vmul.f32 %v1091_v8, %v1059_v49 }
 0x8f9   :  { %v1096_v28 = vmul.f32 %v1094_v17, %v1093_v14 }
 0x8fb   :  { %v2815_v1 = vadd.f32 %v1097_v24, %v1096_v28 }
 0x8fd   :  { %2191 = vmatmul.msk.f32.gmra.mxu1 %vm82_vm1, %v2815_v1 }
 0x972   :  { %v1150_v4 = vpop.f32.mrf.mxu1 }
 0x973   :  { %v2824_v15 = vadd.f32 %v1150_v4, %v1126_v35 }
 0x975   :  { %1158 = vrot.lane.b32.xlu1 %v2824_v15, %s2541_s1  ;;  %1162 = vrot.lane.b32.xlu2 %v2824_v15, %s2542_s23 }
 0x97a   :  { %v1153_v16 = vpop.f32.mrf.mxu1 }
 0x97b   :  { %v2830_v18 = vadd.f32 %v1153_v16, %v1126_v35 }
 0x97d   :  { %1168 = vrot.lane.b32.xlu1 %v2830_v18, %s2540_s0  ;;  %1164 = vrot.lane.b32.xlu2 %v2830_v18, %s2542_s23 }
 0x985   :  { %1170 = vrot.lane.b32.xlu1 %v2824_v15, %s2543_s24  ;;  %1160 = vrot.lane.b32.xlu2 %v2830_v18, %s2541_s1 }
 0x98d   :  { %1166 = vrot.lane.b32.xlu2 %v2824_v15, %s2540_s0 }
 0x995   :  { %1196 = vrot.lane.b32.xlu2 %v2830_v18, %s2543_s24 }
 0x9cf   :  { %v2844_v27 = vpop.permute.xlu2 %1162 }
 0x9d0   :  { %1274 = vrot.lane.b32.xlu0 %v2844_v27, %s2543_s24  ;;  %v2353_v16 = vpack.i.bf16 %v2844_v27, %v2830_v18 }
 0x9d7   :  { %v2848_v30 = vpop.permute.xlu2 %1164 }
 0x9d8   :  { %1300 = vrot.lane.b32.xlu1 %v2848_v30, %s2543_s24 }
 0x9df   :  { %v2852_v36 = vpop.permute.xlu2 %1160 }
 0x9e7   :  { %v2854_v37 = vpop.permute.xlu1 %1158  ;;  %v2856_v38 = vpop.permute.xlu2 %1166 }
 0x9e8   :  { %1222 = vrot.lane.b32.xlu2 %v2854_v37, %s2543_s24  ;;  %1326 = vrot.lane.b32.xlu1 %v2856_v38, %s2543_s24  ;;  %v2348_v24 = vpack.i.bf16 %v2854_v37, %v2824_v15 }
 0x9ef   :  { %v2862_v40 = vpop.permute.xlu1 %1168  ;;  %v1197_v41 = vpop.permute.xlu2 %1196 }
 0x9f0   :  { %1248 = vrot.lane.b32.xlu2 %v2852_v36, %s2543_s24  ;;  %2194 = vmatpush.xpose.msk.msrb.mxu2 %vm212_vm6, %v1197_v41 }
 0x9f3   :  { %2195 = vmatmul.msk.f32.vlgmr.msrb.gmra.mxu2 %vm212_vm6, %v2830_v18 }
 0x9f7   :  { %v1171_v42 = vpop.permute.xlu1 %1170 }
 0x9f8   :  { %2192 = vmatpush.xpose.msk.msrb.mxu0 %vm212_vm6, %v1171_v42  ;;  %1352 = vrot.lane.b32.xlu2 %v2862_v40, %s2543_s24 }
 0x9fb   :  { %2193 = vmatmul.msk.f32.vlgmr.msrb.gmra.mxu0 %vm212_vm6, %v2824_v15 }
 0xa42   :  { %v1275_v43 = vpop.permute.xlu0 %1274  ;;  %v1223_v44 = vpop.permute.xlu2 %1222 }
 0xa43   :  { %2196 = vmatpush.xpose.msk.msra.mxu1 %vm212_vm6, %v1223_v44  ;;  %2200 = vmatpush.xpose.msk.msra.mxu2 %vm212_vm6, %v1275_v43 }
 0xa46   :  { %2197 = vmatmul.msk.f32.vlgmr.msra.gmra.mxu1 %vm212_vm6, %v2854_v37  ;;  %2201 = vmatmul.msk.f32.vlgmr.msra.gmra.mxu2 %vm212_vm6, %v2844_v27 }
 0xa4a   :  { %v1301_v45 = vpop.permute.xlu1 %1300  ;;  %v1249_v46 = vpop.permute.xlu2 %1248 }
 0xa4b   :  { %2198 = vmatpush.xpose.msk.msra.mxu0 %vm212_vm6, %v1249_v46  ;;  %2202 = vmatpush.xpose.msk.msra.mxu3 %vm212_vm6, %v1301_v45 }
 0xa4e   :  { %2199 = vmatmul.msk.f32.vlgmr.msra.gmra.mxu0 %vm212_vm6, %v2852_v36  ;;  %2203 = vmatmul.msk.f32.vlgmr.msra.gmra.mxu3 %vm212_vm6, %v2848_v30 }
 0xa52   :  { %v1353_v47 = vpop.permute.xlu2 %1352 }
 0xa53   :  { %2206 = vmatpush.xpose.msk.msrb.mxu0 %vm212_vm6, %v1353_v47 }
 0xa56   :  { %2207 = vmatmul.msk.f32.vlgmr.msrb.gmra.mxu0 %vm212_vm6, %v2862_v40 }
 0xa5a   :  { %v1327_v12 = vpop.permute.xlu1 %1326 }
 0xa5b   :  { %2204 = vmatpush.xpose.msk.msrb.mxu1 %vm212_vm6, %v1327_v12 }
 0xa5e   :  { %2205 = vmatmul.msk.f32.vlgmr.msrb.gmra.mxu1 %vm212_vm6, %v2856_v38 }
 0xa76   :  { %v1219_v48 = vpop.f32.mrf.mxu2 }
 0xa77   :  { %v1379_v49 = vmul.f32 0.35355338, %v1219_v48 }
 0xa78   :  { %v1193_v21 = vpop.f32.mrf.mxu0 }
 0xa79   :  { %v1378_v39 = vmul.f32 0.35355338, %v1193_v21  ;;  %v1389_v56 = vsel %vm212_vm6, %v1379_v49, -inf }
 0xa7a   :  { %1390 = vmax.xlane.f32.xlu2 %v1389_v56 }
 0xa7b   :  { %v1386_v26 = vsel %vm212_vm6, %v1378_v39, -inf }
 0xa7c   :  { %1387 = vmax.xlane.f32.xlu0 %v1386_v26 }
 0xac3   :  { %v1245_v57 = vpop.f32.mrf.mxu1 }
 0xac4   :  { %v1380_v60 = vmul.f32 0.35355338, %v1245_v57 }
 0xac6   :  { %v1392_v19 = vsel %vm212_vm6, %v1380_v60, -inf }
 0xac7   :  { %1393 = vmax.xlane.f32.xlu1 %v1392_v19 }
 0xac9   :  { %v1297_v61 = vpop.f32.mrf.mxu2 }
 0xaca   :  { %v1382_v32 = vmul.f32 0.35355338, %v1297_v61 }
 0xacb   :  { %v1271_v62 = vpop.f32.mrf.mxu0 }
 0xacc   :  { %v1381_v33 = vmul.f32 0.35355338, %v1271_v62  ;;  %v1398_v63 = vsel %vm212_vm6, %v1382_v32, -inf }
 0xacd   :  { %1399 = vmax.xlane.f32.xlu0 %v1398_v63 }
 0xace   :  { %v1395_v0 = vsel %vm212_vm6, %v1381_v33, -inf }
 0xacf   :  { %1396 = vmax.xlane.f32.xlu1 %v1395_v0 }
 0xad1   :  { %v1323_v2 = vpop.f32.mrf.mxu3 }
 0xad2   :  { %v1383_v3 = vmul.f32 0.35355338, %v1323_v2 }
 0xad3   :  { %v1375_v9 = vpop.f32.mrf.mxu0 }
 0xad4   :  { %v1385_v10 = vmul.f32 0.35355338, %v1375_v9  ;;  %v1401_v13 = vsel %vm212_vm6, %v1383_v3, -inf }
 0xad5   :  { %1402 = vmax.xlane.f32.xlu0 %v1401_v13 }
 0xad6   :  { %v1407_v17 = vsel %vm212_vm6, %v1385_v10, -inf }
 0xad7   :  { %1408 = vmax.xlane.f32.xlu1 %v1407_v17 }
 0xadb   :  { %v1349_v20 = vpop.f32.mrf.mxu1 }
 0xadc   :  { %v1384_v22 = vmul.f32 0.35355338, %v1349_v20 }
 0xade   :  { %v1404_v23 = vsel %vm212_vm6, %v1384_v22, -inf }
 0xadf   :  { %1405 = vmax.xlane.f32.xlu2 %v1404_v23 }
 0xae9   :  { %2349 = vrot.lane.b32.xlu0 %v2348_v24, %s2537_s21 }
 0xaed   :  { %v1391_v58 = vpop.xlane.xlu2 %1390 }
 0xaee   :  { %v1411_v59 = vsub.f32 %v1379_v49, %v1391_v58 }
 0xaef   :  { %v1388_v25 = vpop.xlane.xlu0 %1387 }
 0xaf0   :  { %v1420_v7 = vmul.f32 1.442695, %v1411_v59  ;;  %v1410_v8 = vsub.f32 %v1378_v39, %v1388_v25 }
 0xaf2   :  { %2433 = vpow2.f32 %v1420_v7  ;;  %v1418_v14 = vmul.f32 1.442695, %v1410_v8 }
 0xaf4   :  { %2435 = vpow2.f32 %v1418_v14 }
 0xaf8   :  { %v2903_v28 = vpop.eup %2433 }
 0xaf9   :  { %v1437_v35 = vsel %vm212_vm6, %v2903_v28, 0.0 }
 0xafa   :  { %v2907_v4 = vpop.eup %2435  ;;  %1438 = vadd.xlane.f32.xlu1 %v1437_v35 }
 0xafb   :  { %v1434_v15 = vsel %vm212_vm6, %v2907_v4, 0.0 }
 0xafc   :  { %1435 = vadd.xlane.f32.xlu2 %v1434_v15 }
 0xb14   :  { %2354 = vrot.lane.b32.xlu2 %v2353_v16, %s2537_s21 }
 0xb3a   :  { %v1394_v37 = vpop.xlane.xlu1 %1393 }
 0xb3b   :  { %v1412_v41 = vsub.f32 %v1380_v60, %v1394_v37 }
 0xb3d   :  { %v1422_v42 = vmul.f32 1.442695, %v1412_v41 }
 0xb3f   :  { %2437 = vpow2.f32 %v1422_v42 }
 0xb40   :  { %v1400_v43 = vpop.xlane.xlu0 %1399 }
 0xb41   :  { %v1414_v44 = vsub.f32 %v1382_v32, %v1400_v43 }
 0xb42   :  { %v1397_v45 = vpop.xlane.xlu1 %1396 }
 0xb43   :  { %v1426_v46 = vmul.f32 1.442695, %v1414_v44  ;;  %v1413_v47 = vsub.f32 %v1381_v33, %v1397_v45 }
 0xb45   :  { %v2914_v12 = vpop.eup %2437  ;;  %2439 = vpow2.f32 %v1426_v46  ;;  %v1424_v48 = vmul.f32 1.442695, %v1413_v47 }
 0xb46   :  { %v1440_v49 = vsel %vm212_vm6, %v2914_v12, 0.0 }
 0xb47   :  { %2441 = vpow2.f32 %v1424_v48  ;;  %1441 = vadd.xlane.f32.xlu0 %v1440_v49  ;;  %v2358_v49 = vpack.i.bf16 %v2856_v38, %v2852_v36 }
 0xb48   :  { %v1403_v18 = vpop.xlane.xlu0 %1402 }
 0xb49   :  { %v1415_v27 = vsub.f32 %v1383_v3, %v1403_v18 }
 0xb4a   :  { %v1409_v60 = vpop.xlane.xlu1 %1408 }
 0xb4b   :  { %v2918_v21 = vpop.eup %2439  ;;  %v1428_v39 = vmul.f32 1.442695, %v1415_v27  ;;  %v1417_v33 = vsub.f32 %v1385_v10, %v1409_v60 }
 0xb4c   :  { %v1446_v56 = vsel %vm212_vm6, %v2918_v21, 0.0 }
 0xb4d   :  { %v2922_v26 = vpop.eup %2441  ;;  %2443 = vpow2.f32 %v1428_v39  ;;  %1447 = vadd.xlane.f32.xlu2 %v1446_v56  ;;  %v1432_v0 = vmul.f32 1.442695, %v1417_v33 }
 0xb4e   :  { %v1443_v57 = vsel %vm212_vm6, %v2922_v26, 0.0 }
 0xb4f   :  { %1444 = vadd.xlane.f32.xlu0 %v1443_v57 }
 0xb52   :  { %v1406_v19 = vpop.xlane.xlu2 %1405 }
 0xb53   :  { %v2926_v61 = vpop.eup %2443  ;;  %v1416_v32 = vsub.f32 %v1384_v22, %v1406_v19 }
 0xb54   :  { %v1449_v62 = vsel %vm212_vm6, %v2926_v61, 0.0 }
 0xb55   :  { %v1430_v63 = vmul.f32 1.442695, %v1416_v32  ;;  %1450 = vadd.xlane.f32.xlu2 %v1449_v62 }
 0xb57   :  { %2445 = vpow2.f32 %v1430_v63 }
 0xb58   :  { %2447 = vpow2.f32 %v1432_v0 }
 0xb5b   :  { %v2350_v2 = vpop.permute.xlu0 %2349 }
 0xb5c   :  { %v2352_v3 = vunpack.i.h.bf16 %v2350_v2  ;;  %v2351_v9 = vunpack.i.l.bf16 %v2350_v2 }
 0xb5d   :  { %v2930_v13 = vpop.eup %2445 }
 0xb5e   :  { %1599 = vmatpush.msrb.mxu2 %v2351_v9  ;;  %1651 = vmatpush.msra.mxu1 %v2352_v3  ;;  %v1452_v17 = vsel %vm212_vm6, %v2930_v13, 0.0  ;;  %v2934_v20 = vpop.eup %2447 }
 0xb5f   :  { %1453 = vadd.xlane.f32.xlu1 %v1452_v17  ;;  %v1455_v10 = vsel %vm212_vm6, %v2934_v20, 0.0 }
 0xb63   :  { %1708 = vrot.lane.b32.xlu0 %v2848_v30, %s2537_s21 }
 0xb67   :  { %1456 = vadd.xlane.f32.xlu1 %v1455_v10 }
 0xb6d   :  { %1760 = vrot.lane.b32.xlu2 %v2862_v40, %s2537_s21  ;;  %v1439_v22 = vpop.xlane.xlu1 %1438 }
 0xb6e   :  { %2449 = vrcp.f32 %v1439_v22  ;;  %v1484_v14 = vand.u32 2147483648, %v1439_v22  ;;  %v1482_v16 = vand.u32 2147483647, %v1439_v22  ;;  %vm1478_vm3 = vweird.f32 %v1439_v22 }
 0xb6f   :  { %v1436_v23 = vpop.xlane.xlu2 %1435 }
 0xb70   :  { %2451 = vrcp.f32 %v1436_v23  ;;  %v1469_v41 = vand.u32 2147483648, %v1436_v23  ;;  %v1467_v43 = vand.u32 2147483647, %v1436_v23  ;;  %v1485_v44 = vor.u32 1.1754944e-38, %v1484_v14 }
 0xb71   :  { %vm1483_vm7 = vcmp.eq.f32.partialorder %v1482_v16, 8.507059e+37  ;;  %vm1463_vm9 = vweird.f32 %v1436_v23 }
 0xb72   :  { %v1470_v48 = vor.u32 1.1754944e-38, %v1469_v41  ;;  %vm1468_vm11 = vcmp.eq.f32.partialorder %v1467_v43, 8.507059e+37 }
 0xb74   :  { %v2450_v24 = vpop.eup %2449 }
 0xb75   :  { %v1474_v58 = vmul.f32 %v2450_v24, %v1439_v22  ;;  %vm1479_vm2 = vweird.f32 %v2450_v24 }
 0xb76   :  { %v2452_v59 = vpop.eup %2451  ;;  %vm1480_vm5 = vmor %vm1478_vm3, %vm1479_vm2 }
 0xb77   :  { %v1475_v25 = vsub.f32 1.0, %v1474_v58  ;;  %v1459_v7 = vmul.f32 %v2452_v59, %v1436_v23  ;;  %v2355_v8 = vpop.permute.xlu2 %2354  ;;  %vm1464_vm4 = vweird.f32 %v2452_v59 }
 0xb78   :  { %v2357_v35 = vunpack.i.h.bf16 %v2355_v8  ;;  %v2356_v30 = vunpack.i.l.bf16 %v2355_v8  ;;  %vm1465_vm10 = vmor %vm1463_vm9, %vm1464_vm4 }
 0xb79   :  { %v1476_v15 = vmul.f32 %v2450_v24, %v1475_v25  ;;  %v1460_v37 = vsub.f32 1.0, %v1459_v7 }
 0xb7a   :  { %1625 = vmatpush.msrb.mxu3 %v2356_v30  ;;  %1703 = vmatpush.msra.mxu2 %v2357_v35 }
 0xb7b   :  { %v1477_v40 = vadd.f32 %v2450_v24, %v1476_v15  ;;  %v1461_v42 = vmul.f32 %v2452_v59, %v1460_v37 }
 0xb7d   :  { %v1481_v45 = vsel %vm1480_vm5, %v2450_v24, %v1477_v40  ;;  %v1462_v46 = vadd.f32 %v2452_v59, %v1461_v42 }
 0xb7e   :  { %v1486_v47 = vsel %vm1483_vm7, %v1485_v44, %v1481_v45 }
 0xb7f   :  { %v1466_v18 = vsel %vm1465_vm10, %v2452_v59, %v1462_v46  ;;  %v1487_v27 = vmul.f32 %v2903_v28, %v1486_v47 }
 0xb80   :  { %v1471_v39 = vsel %vm1468_vm11, %v1470_v48, %v1466_v18  ;;  %2359 = vrot.lane.b32.xlu1 %v2358_v49, %s2537_s21 }
 0xb81   :  { %2209 = vmatmul.msk.f32.vlgmr.msrb.gmra.mxu3 %vm212_vm6, %v1487_v27  ;;  %v1472_v56 = vmul.f32 %v2907_v4, %v1471_v39 }
 0xb83   :  { %2208 = vmatmul.msk.f32.vlgmr.msrb.gmra.mxu2 %vm212_vm6, %v1472_v56 }
 0xbba   :  { %v1442_v57 = vpop.xlane.xlu0 %1441 }
 0xbbb   :  { %2453 = vrcp.f32 %v1442_v57  ;;  %v1499_v38 = vand.u32 2147483648, %v1442_v57  ;;  %v1497_v28 = vand.u32 2147483647, %v1442_v57  ;;  %vm1493_vm14 = vweird.f32 %v1442_v57 }
 0xbbd   :  { %v1500_v4 = vor.u32 1.1754944e-38, %v1499_v38  ;;  %vm1498_vm2 = vcmp.eq.f32.partialorder %v1497_v28, 8.507059e+37 }
 0xbc0   :  { %v1448_v60 = vpop.xlane.xlu2 %1447 }
 0xbc1   :  { %v2454_v19 = vpop.eup %2453  ;;  %2455 = vrcp.f32 %v1448_v60  ;;  %v1529_v10 = vand.u32 2147483648, %v1448_v60  ;;  %v1527_v23 = vand.u32 2147483647, %v1448_v60  ;;  %vm1523_vm4 = vweird.f32 %v1448_v60 }
 0xbc2   :  { %v1489_v32 = vmul.f32 %v2454_v19, %v1442_v57  ;;  %vm1494_vm12 = vweird.f32 %v2454_v19  ;;  %v1445_v58 = vpop.xlane.xlu0 %1444 }
 0xbc3   :  { %vm1495_vm15 = vmor %vm1493_vm14, %vm1494_vm12  ;;  %v1530_v7 = vor.u32 1.1754944e-38, %v1529_v10  ;;  %vm1528_vm7 = vcmp.eq.f32.partialorder %v1527_v23, 8.507059e+37  ;;  %v1512_v28 = vand.u32 2147483647, %v1445_v58 }
 0xbc4   :  { %v1490_v36 = vsub.f32 1.0, %v1489_v32 }
 0xbc6   :  { %v1491_v62 = vmul.f32 %v2454_v19, %v1490_v36 }
 0xbc7   :  { %v2456_v33 = vpop.eup %2455 }
 0xbc8   :  { %v1492_v63 = vadd.f32 %v2454_v19, %v1491_v62  ;;  %v1519_v0 = vmul.f32 %v2456_v33, %v1448_v60  ;;  %v1451_v2 = vpop.xlane.xlu2 %1450  ;;  %vm1524_vm3 = vweird.f32 %v2456_v33  ;;  %v1514_v62 = vand.u32 2147483648, %v1445_v58 }
 0xbc9   :  { %2457 = vrcp.f32 %v1451_v2  ;;  %vm1525_vm5 = vmor %vm1523_vm4, %vm1524_vm3  ;;  %v1544_v37 = vand.u32 2147483648, %v1451_v2  ;;  %vm1538_vm10 = vweird.f32 %v1451_v2 }
 0xbca   :  { %v1496_v3 = vsel %vm1495_vm15, %v2454_v19, %v1492_v63  ;;  %v1520_v9 = vsub.f32 1.0, %v1519_v0  ;;  %2459 = vrcp.f32 %v1445_v58 }
 0xbcb   :  { %v1501_v17 = vsel %vm1498_vm2, %v1500_v4, %v1496_v3  ;;  %v1545_v43 = vor.u32 1.1754944e-38, %v1544_v37  ;;  %vm1508_vm2 = vweird.f32 %v1445_v58  ;;  %v1515_v4 = vor.u32 1.1754944e-38, %v1514_v62 }
 0xbcc   :  { %v1521_v22 = vmul.f32 %v2456_v33, %v1520_v9  ;;  %v1502_v24 = vmul.f32 %v2914_v12, %v1501_v17  ;;  %v1542_v12 = vand.u32 2147483647, %v1451_v2 }
 0xbce   :  { %v1522_v59 = vadd.f32 %v2456_v33, %v1521_v22  ;;  %2210 = vmatmul.msk.f32.vlgmr.msra.gmra.mxu1 %vm212_vm6, %v1502_v24  ;;  %vm1543_vm12 = vcmp.eq.f32.partialorder %v1542_v12, 8.507059e+37 }
 0xbcf   :  { %v2458_v25 = vpop.eup %2457 }
 0xbd0   :  { %v1526_v8 = vsel %vm1525_vm5, %v2456_v33, %v1522_v59  ;;  %v1534_v14 = vmul.f32 %v2458_v25, %v1451_v2  ;;  %vm1539_vm9 = vweird.f32 %v2458_v25  ;;  %v2460_v46 = vpop.eup %2459 }
 0xbd1   :  { %v1531_v35 = vsel %vm1528_vm7, %v1530_v7, %v1526_v8  ;;  %vm1540_vm11 = vmor %vm1538_vm10, %vm1539_vm9  ;;  %v1504_v49 = vmul.f32 %v2460_v46, %v1445_v58  ;;  %vm1509_vm14 = vweird.f32 %v2460_v46  ;;  %vm1513_vm7 = vcmp.eq.f32.partialorder %v1512_v28, 8.507059e+37  ;;  %v1761_v8 = vpop.permute.xlu2 %1760 }
 0xbd2   :  { %v1535_v30 = vsub.f32 1.0, %v1534_v14  ;;  %v1454_v15 = vpop.xlane.xlu1 %1453  ;;  %v1532_v16 = vmul.f32 %v2918_v21, %v1531_v35  ;;  %vm1510_vm3 = vmor %vm1508_vm2, %vm1509_vm14 }
 0xbd3   :  { %2461 = vrcp.f32 %v1454_v15  ;;  %v1505_v27 = vsub.f32 1.0, %v1504_v49  ;;  %vm1553_vm4 = vweird.f32 %v1454_v15  ;;  %v1557_v33 = vand.u32 2147483647, %v1454_v15 }
 0xbd4   :  { %v1536_v41 = vmul.f32 %v2458_v25, %v1535_v30  ;;  %2212 = vmatmul.msk.f32.vlgmr.msra.gmra.mxu2 %vm212_vm6, %v1532_v16 }
 0xbd5   :  { %v1709_v40 = vpop.permute.xlu0 %1708  ;;  %v1506_v57 = vmul.f32 %v2460_v46, %v1505_v27  ;;  %vm1558_vm9 = vcmp.eq.f32.partialorder %v1557_v33, 8.507059e+37 }
 0xbd6   :  { %v1537_v42 = vadd.f32 %v2458_v25, %v1536_v41  ;;  %1729 = vmatpush.msra.mxu3 %v1709_v40 }
 0xbd7   :  { %v1507_v32 = vadd.f32 %v2460_v46, %v1506_v57 }
 0xbd8   :  { %v1541_v44 = vsel %vm1540_vm11, %v2458_v25, %v1537_v42 }
 0xbd9   :  { %v1546_v45 = vsel %vm1543_vm12, %v1545_v43, %v1541_v44  ;;  %v2462_v48 = vpop.eup %2461  ;;  %v1511_v63 = vsel %vm1510_vm3, %v2460_v46, %v1507_v32 }
 0xbda   :  { %v1457_v47 = vpop.xlane.xlu1 %1456  ;;  %v1547_v21 = vmul.f32 %v2926_v61, %v1546_v45  ;;  %v1549_v18 = vmul.f32 %v2462_v48, %v1454_v15  ;;  %vm1554_vm15 = vweird.f32 %v2462_v48  ;;  %v1559_v61 = vand.u32 2147483648, %v1454_v15 }
 0xbdb   :  { %2463 = vrcp.f32 %v1457_v47  ;;  %vm1555_vm5 = vmor %vm1553_vm4, %vm1554_vm15  ;;  %v1516_v9 = vsel %vm1513_vm7, %v1515_v4, %v1511_v63  ;;  %v1574_v23 = vand.u32 2147483648, %v1457_v47  ;;  %vm1568_vm11 = vweird.f32 %v1457_v47  ;;  %v2293_v63 = vld [vmem:[#allocation4 + $0x78] sm:$0xff]  }
 0xbdc   :  { %2213 = vmatmul.msk.f32.vlgmr.msra.gmra.mxu3 %vm212_vm6, %v1547_v21  ;;  %v1550_v39 = vsub.f32 1.0, %v1549_v18  ;;  %v1560_v3 = vor.u32 1.1754944e-38, %v1559_v61  ;;  %v1572_v58 = vand.u32 2147483647, %v1457_v47  ;;  %v1517_v25 = vmul.f32 %v2922_v26, %v1516_v9 }
 0xbdd   :  { %v1575_v35 = vor.u32 1.1754944e-38, %v1574_v23  ;;  %v2363_v26 = vpack.i.bf16 %v2258_v52, %v2259_v51 }
 0xbde   :  { %v1551_v60 = vmul.f32 %v2462_v48, %v1550_v39  ;;  %vm1573_vm14 = vcmp.eq.f32.partialorder %v1572_v58, 8.507059e+37 }
 0xbdf   :  { %2364 = vrot.lane.b32.xlu0 %v2363_v26, %s2544_s25  ;;  %v2295_v26 = vld [vmem:[#allocation4 + $0x88] sm:$0xff]  }
 0xbe0   :  { %v1552_v36 = vadd.f32 %v2462_v48, %v1551_v60  ;;  %v1816_v60 = vperm.slane %v1125_v34, 1 }
 0xbe1   :  { %v2464_v56 = vpop.eup %2463 }
 0xbe2   :  { %v1564_v19 = vmul.f32 %v2464_v56, %v1457_v47  ;;  %v1556_v0 = vsel %vm1555_vm5, %v2462_v48, %v1552_v36  ;;  %vm1569_vm10 = vweird.f32 %v2464_v56 }
 0xbe3   :  { %v1561_v17 = vsel %vm1558_vm9, %v1560_v3, %v1556_v0  ;;  %vm1570_vm12 = vmor %vm1568_vm11, %vm1569_vm10  ;;  %v2266_v0 = vunpack.c.l.bf16 %v2293_v63 }
 0xbe4   :  { %v1565_v38 = vsub.f32 1.0, %v1564_v19  ;;  %v1562_v7 = vmul.f32 %v2930_v13, %v1561_v17  ;;  %v2368_v13 = vpack.i.bf16 %v2254_v55, %v2255_v54 }
 0xbe6   :  { %v1566_v2 = vmul.f32 %v2464_v56, %v1565_v38  ;;  %2369 = vrot.lane.b32.xlu2 %v2368_v13, %s2544_s25  ;;  %v2294_v13 = vld [vmem:[#allocation4 + $0x80] sm:$0xff]  }
 0xbe8   :  { %v1567_v10 = vadd.f32 %v2464_v56, %v1566_v2  ;;  %v2267_v2 = vunpack.c.h.bf16 %v2293_v63 }
 0xbea   :  { %v1571_v14 = vsel %vm1570_vm12, %v2464_v56, %v1567_v10  ;;  %v2373_v4 = vpack.i.bf16 %v2266_v0, %v2267_v2 }
 0xbeb   :  { %v1576_v30 = vsel %vm1573_vm14, %v1575_v35, %v1571_v14 }
 0xbec   :  { %v1577_v15 = vmul.f32 %v2934_v20, %v1576_v30 }
 0xbf2   :  { %v2360_v22 = vpop.permute.xlu1 %2359 }
 0xbf3   :  { %v2362_v24 = vunpack.i.h.bf16 %v2360_v22  ;;  %v2361_v59 = vunpack.i.l.bf16 %v2360_v22 }
 0xbf5   :  { %1677 = vmatpush.msra.mxu0 %v2361_v59  ;;  %1755 = vmatpush.msrb.mxu1 %v2362_v24  ;;  %v2292_v24 = vld [vmem:[#allocation4 + $0x70] sm:$0xff]  }
 0xbf6   :  { %2211 = vmatmul.msk.f32.vlgmr.msra.gmra.mxu0 %vm212_vm6, %v1517_v25  ;;  %2214 = vmatmul.msk.f32.vlgmr.msrb.gmra.mxu1 %vm212_vm6, %v1562_v7  ;;  %v2262_v59 = vunpack.c.l.bf16 %v2292_v24  ;;  %v2263_v58 = vunpack.c.h.bf16 %v2292_v24 }
 0xbf7   :  { %1781 = vmatpush.msrb.mxu0 %v1761_v8 }
 0xbf8   :  { %v2378_v25 = vpack.i.bf16 %v2262_v59, %v2263_v58 }
 0xbfe   :  { %2215 = vmatmul.msk.f32.vlgmr.msrb.gmra.mxu0 %vm212_vm6, %v1577_v15 }
 0xc04   :  { %v1627_v37 = vpop.f32.mrf.mxu3 }
 0xc06   :  { %v1601_v20 = vpop.f32.mrf.mxu2 }
 0xc40   :  { %v2370_v40 = vpop.permute.xlu2 %2369 }
 0xc41   :  { %v2371_v42 = vunpack.i.l.bf16 %v2370_v40  ;;  %v2372_v43 = vunpack.i.h.bf16 %v2370_v40 }
 0xc4b   :  { %v1653_v16 = vpop.f32.mrf.mxu1 }
 0xc4c   :  { %1788 = vrot.lane.b32.xlu1 %v1653_v16, %s2535_s18  ;;  %v2275_v16 = vunpack.c.h.bf16 %v2295_v26 }
 0xc4e   :  { %1981 = vmatpush.msra.mxu1 %v2275_v16 }
 0xc51   :  { %v2365_v53 = vpop.permute.xlu0 %2364 }
 0xc52   :  { %v2367_v54 = vunpack.i.h.bf16 %v2365_v53  ;;  %v2366_v55 = vunpack.i.l.bf16 %v2365_v53 }
 0xc54   :  { %1851 = vmatpush.msrb.mxu2 %v2366_v55 }
 0xc56   :  { %1852 = vmatpush.msrb.mxu2 %v2367_v54  ;;  %v1864_v54 = vld [vmem:[#allocation4 + $0x90] sm:$0x2] }
 0xc57   :  { %v1705_v41 = vpop.f32.mrf.mxu2 }
 0xc58   :  { %1796 = vrot.lane.b32.xlu0 %v1705_v41, %s2545_s26  ;;  %1853 = vmatpush.msrb.mxu2 %v2371_v42  ;;  %v1865_v42 = vunpack.c.l.bf16 %v1864_v54 }
 0xc5a   :  { %1854 = vmatpush.msrb.mxu2 %v2372_v43 }
 0xc5f   :  { %v1731_v12 = vpop.f32.mrf.mxu3 }
 0xc60   :  { %1798 = vrot.lane.b32.xlu0 %v1731_v12, %s2545_s26  ;;  %v2271_v12 = vunpack.c.h.bf16 %v2294_v13 }
 0xc73   :  { %v1679_v50 = vpop.f32.mrf.mxu0  ;;  %v1757_v51 = vpop.f32.mrf.mxu1 }
 0xc74   :  { %1804 = vrot.lane.b32.xlu1 %v1757_v51, %s2546_s27  ;;  %1790 = vrot.lane.b32.xlu2 %v1679_v50, %s2535_s18 }
 0xc7b   :  { %v1783_v52 = vpop.f32.mrf.mxu0 }
 0xc7c   :  { %1806 = vrot.lane.b32.xlu1 %v1783_v52, %s2546_s27  ;;  %v2270_v52 = vunpack.c.l.bf16 %v2294_v13 }
 0xcbe   :  { %v1789_v44 = vpop.permute.xlu1 %1788 }
 0xcbf   :  { %v1810_v46 = vsel %vm212_vm6, %v1601_v20, %v1789_v44  ;;  %v2274_v20 = vunpack.c.l.bf16 %v2295_v26 }
 0xcc1   :  { %1982 = vmatpush.msra.mxu1 %v2274_v20 }
 0xcc3   :  { %1983 = vmatpush.msra.mxu1 %v2271_v12 }
 0xcc5   :  { %1984 = vmatpush.msra.mxu1 %v2270_v52 }
 0xcc7   :  { %1985 = vmatpush.msra.mxu1 %v2267_v2 }
 0xcc9   :  { %1986 = vmatpush.msra.mxu1 %v2266_v0 }
 0xcca   :  { %v1797_v45 = vpop.permute.xlu0 %1796 }
 0xccb   :  { %v1812_v47 = vsel %vm52_vm0, %v1810_v46, %v1797_v45  ;;  %1987 = vmatpush.msra.mxu1 %v2263_v58 }
 0xccd   :  { %1988 = vmatpush.msra.mxu1 %v2262_v59 }
 0xcce   :  { %v1791_v49 = vpop.permute.xlu2 %1790 }
 0xccf   :  { %v1811_v27 = vsel %vm212_vm6, %v1627_v37, %v1791_v49 }
 0xcd2   :  { %v1799_v18 = vpop.permute.xlu0 %1798 }
 0xcd3   :  { %v1813_v39 = vsel %vm52_vm0, %v1811_v27, %v1799_v18  ;;  %v1913_v18 = vperm.slane %v1865_v42, 3 }
 0xce6   :  { %v1805_v21 = vpop.permute.xlu1 %1804 }
 0xce7   :  { %v1814_v48 = vsel %vm855_vm13, %v1812_v47, %v1805_v21  ;;  %v1910_v47 = vperm.slane %v1865_v42, 2 }
 0xce8   :  { %2216 = vmatmul.msk.f32.vlgmr.msrb.gmra.mxu2 %vm82_vm1, %v1814_v48 }
 0xcee   :  { %v1807_v56 = vpop.permute.xlu1 %1806 }
 0xcef   :  { %v1815_v57 = vsel %vm855_vm13, %v1813_v39, %v1807_v56 }
 0xcf0   :  { %2217 = vmatmul.msk.f32.gmra.mxu2 %vm82_vm1, %v1815_v57 }
 0xd6b   :  { %v1856_v19 = vpop.f32.mrf.mxu2 }
 0xd6c   :  { %v1857_v32 = vadd.f32 %v1856_v19, %v1816_v60 }
 0xd6e   :  { %v1862_v36 = vadd.f32 %v1857_v32, %v2811_v11 }
 0xd70   :  { %v1866_v38 = vsel %vm82_vm1, %v1862_v36, 0.0 }
 0xd71   :  { %1867 = vadd.xlane.f32.xlu2 %v1866_v38 }
 0xd73   :  { %v1859_v62 = vpop.f32.mrf.mxu2 }
 0xd74   :  { %v1860_v61 = vadd.f32 %v1859_v62, %v1816_v60 }
 0xd76   :  { %v1863_v28 = vadd.f32 %v1860_v61, %v2815_v1 }
 0xd78   :  { %v1869_v33 = vsel %vm82_vm1, %v1863_v28, 0.0 }
 0xd79   :  { %1870 = vadd.xlane.f32.xlu0 %v1869_v33  ;;  %v1916_v33 = vld [vmem:[#allocation4 + $0x90] sm:$0x8] }
 0xd7a   :  { %v1917_v63 = vunpack.c.l.bf16 %v1916_v33 }
 0xd7c   :  { %v1918_v0 = vperm.slane %v1917_v63, 6 }
 0xd8d   :  { %2374 = vrot.lane.b32.xlu0 %v2373_v4, %s2543_s24 }
 0xde4   :  { %v1868_v29 = vpop.xlane.xlu2 %1867 }
 0xde5   :  { %v1872_v34 = vmul.f32 %v1868_v29, %v2768_v31 }
 0xde7   :  { %v1874_v11 = vsub.f32 %v1862_v36, %v1872_v34 }
 0xde9   :  { %v1876_v3 = vmul.f32 %v1874_v11, %v1874_v11 }
 0xdeb   :  { %v1878_v9 = vsel %vm82_vm1, %v1876_v3, 0.0 }
 0xdec   :  { %1879 = vadd.xlane.f32.xlu1 %v1878_v9  ;;  %v1871_v17 = vpop.xlane.xlu0 %1870  ;;  %v1966_v9 = vperm.slane %v1917_v63, 7 }
 0xded   :  { %v1873_v1 = vmul.f32 %v1871_v17, %v2768_v31 }
 0xdef   :  { %v2995_v10 = vsub.f32 %v1863_v28, %v1873_v1 }
 0xdf1   :  { %v1877_v22 = vmul.f32 %v2995_v10, %v2995_v10 }
 0xdf3   :  { %v1881_v23 = vsel %vm82_vm1, %v1877_v22, 0.0 }
 0xdf4   :  { %1882 = vadd.xlane.f32.xlu2 %v1881_v23 }
 0xdff   :  { %v2375_v7 = vpop.permute.xlu0 %2374 }
 0xe00   :  { %v2376_v8 = vunpack.i.l.bf16 %v2375_v7  ;;  %v2377_v14 = vunpack.i.h.bf16 %v2375_v7 }
 0xe02   :  { %1953 = vmatpush.msrb.mxu3 %v2376_v8 }
 0xe04   :  { %1954 = vmatpush.msrb.mxu3 %v2377_v14 }
 0xe05   :  { %2379 = vrot.lane.b32.xlu1 %v2378_v25, %s2543_s24 }
 0xe5f   :  { %v1880_v35 = vpop.xlane.xlu1 %1879 }
 0xe60   :  { %v1884_v30 = vmul.f32 %v1880_v35, %v2768_v31 }
 0xe62   :  { %v1886_v15 = vadd.f32 1e-05, %v1884_v30 }
 0xe64   :  { %2465 = vrsqrt.f32 %v1886_v15  ;;  %vm1894_vm6 = vweird.f32 %v1886_v15 }
 0xe67   :  { %v1883_v37 = vpop.xlane.xlu2 %1882 }
 0xe68   :  { %v1885_v41 = vmul.f32 %v1883_v37, %v2768_v31 }
 0xe6a   :  { %v2466_v50 = vpop.eup %2465  ;;  %v1887_v51 = vadd.f32 1e-05, %v1885_v41 }
 0xe6b   :  { %v1889_v53 = vmul.f32 %v2466_v50, %v1886_v15  ;;  %vm1895_vm0 = vweird.f32 %v2466_v50 }
 0xe6c   :  { %2467 = vrsqrt.f32 %v1887_v51  ;;  %vm1896_vm13 = vmor %vm1894_vm6, %vm1895_vm0  ;;  %vm1904_vm2 = vweird.f32 %v1887_v51 }
 0xe6d   :  { %v1890_v55 = vmul.f32 %v2466_v50, %v1889_v53 }
 0xe6f   :  { %v1891_v40 = vmul.f32 0.5, %v1890_v55  ;;  %v1998_v55 = vld [vmem:[#allocation4 + $0x90] sm:$0x4] }
 0xe70   :  { %v1999_v42 = vunpack.c.l.bf16 %v1998_v55 }
 0xe71   :  { %v1892_v43 = vsub.f32 1.5, %v1891_v40 }
 0xe72   :  { %v2468_v44 = vpop.eup %2467 }
 0xe73   :  { %v1893_v45 = vmul.f32 %v2466_v50, %v1892_v43  ;;  %v1899_v46 = vmul.f32 %v2468_v44, %v1887_v51  ;;  %vm1905_vm15 = vweird.f32 %v2468_v44 }
 0xe74   :  { %vm1906_vm3 = vmor %vm1904_vm2, %vm1905_vm15 }
 0xe75   :  { %v1897_v21 = vsel %vm1896_vm13, %v2466_v50, %v1893_v45  ;;  %v1900_v48 = vmul.f32 %v2468_v44, %v1899_v46 }
 0xe76   :  { %v1908_v49 = vmul.f32 %v1897_v21, %v1874_v11 }
 0xe77   :  { %v1901_v27 = vmul.f32 0.5, %v1900_v48  ;;  %v2380_v39 = vpop.permute.xlu1 %2379 }
 0xe78   :  { %v1911_v56 = vmul.f32 %v1910_v47, %v1908_v49  ;;  %v2381_v57 = vunpack.i.l.bf16 %v2380_v39  ;;  %v2382_v19 = vunpack.i.h.bf16 %v2380_v39 }
 0xe79   :  { %v1902_v60 = vsub.f32 1.5, %v1901_v27 }
 0xe7a   :  { %1955 = vmatpush.msrb.mxu3 %v2381_v57  ;;  %v1914_v32 = vadd.f32 %v1913_v18, %v1911_v56 }
 0xe7b   :  { %v1903_v36 = vmul.f32 %v2468_v44, %v1902_v60 }
 0xe7c   :  { %1956 = vmatpush.msrb.mxu3 %v2382_v19 }
 0xe7d   :  { %v1907_v38 = vsel %vm1906_vm3, %v2468_v44, %v1903_v36  ;;  %2218 = vmatmul.msk.f32.vlgmr.msrb.gmra.mxu3 %vm82_vm1, %v1914_v32 }
 0xe7e   :  { %v1909_v62 = vmul.f32 %v1907_v38, %v2995_v10 }
 0xe80   :  { %v1912_v61 = vmul.f32 %v1910_v47, %v1909_v62  ;;  %v2044_v47 = vperm.slane %v1999_v42, 4 }
 0xe82   :  { %v1915_v28 = vadd.f32 %v1913_v18, %v1912_v61  ;;  %v2047_v18 = vperm.slane %v1999_v42, 5 }
 0xe85   :  { %2219 = vmatmul.msk.f32.gmra.mxu3 %vm82_vm1, %v1915_v28 }
 0xf00   :  { %v1958_v2 = vpop.f32.mrf.mxu3 }
 0xf01   :  { %v1959_v4 = vadd.f32 %v1958_v2, %v1918_v0 }
 0xf03   :  { %v1964_v29 = vmax.f32 %v1959_v4, 0.0 }
 0xf05   :  { %2220 = vmatmul.msk.f32.vlgmr.msra.gmra.mxu1 %vm1016_vm8, %v1964_v29 }
 0xf08   :  { %v1961_v34 = vpop.f32.mrf.mxu3 }
 0xf09   :  { %v1962_v11 = vadd.f32 %v1961_v34, %v1918_v0 }
 0xf0b   :  { %v1965_v3 = vmax.f32 %v1962_v11, 0.0 }
 0xf0d   :  { %2221 = vmatmul.msk.f32.gmra.mxu1 %vm1016_vm8, %v1965_v3 }
 0xf82   :  { %v1990_v17 = vpop.f32.mrf.mxu1 }
 0xf83   :  { %v1991_v1 = vadd.f32 %v1990_v17, %v1966_v9  ;;  %v2296_v17 = vld [vmem:[#allocation4 + $0x8] sm:$0xff]  }
 0xf85   :  { %v1996_v10 = vadd.f32 %v1991_v1, %v1914_v32 }
 0xf87   :  { %v2000_v22 = vsel %vm82_vm1, %v1996_v10, 0.0 }
 0xf88   :  { %2001 = vadd.xlane.f32.xlu2 %v2000_v22 }
 0xf8a   :  { %v1993_v23 = vpop.f32.mrf.mxu1 }
 0xf8b   :  { %v1994_v24 = vadd.f32 %v1993_v23, %v1966_v9  ;;  %v2297_v9 = vld [vmem:[#allocation4 + $0x10] sm:$0xff]  }
 0xf8c   :  { %v2282_v22 = vunpack.c.l.bf16 %v2297_v9 }
 0xf8d   :  { %v1997_v59 = vadd.f32 %v1994_v24, %v1915_v28  ;;  %v2279_v24 = vunpack.c.h.bf16 %v2296_v17 }
 0xf8f   :  { %v2003_v58 = vsel %vm82_vm1, %v1997_v59, 0.0 }
 0xf90   :  { %2004 = vadd.xlane.f32.xlu2 %v2003_v58  ;;  %v2278_v58 = vunpack.c.l.bf16 %v2296_v17 }
 0xffb   :  { %v2002_v25 = vpop.xlane.xlu2 %2001 }
 0xffc   :  { %v2006_v7 = vmul.f32 %v2002_v25, %v2768_v31 }
 0xffe   :  { %v2008_v8 = vsub.f32 %v1996_v10, %v2006_v7  ;;  %v2283_v10 = vunpack.c.h.bf16 %v2297_v9 }
0x1000   :  { %v2010_v14 = vmul.f32 %v2008_v8, %v2008_v8  ;;  %2137 = vmatpush.msra.mxu0 %v2283_v10 }
0x1002   :  { %v2012_v35 = vsel %vm82_vm1, %v2010_v14, 0.0  ;;  %2138 = vmatpush.msra.mxu0 %v2282_v22 }
0x1003   :  { %2013 = vadd.xlane.f32.xlu0 %v2012_v35  ;;  %v2005_v30 = vpop.xlane.xlu2 %2004 }
0x1004   :  { %v2007_v15 = vmul.f32 %v2005_v30, %v2768_v31  ;;  %2139 = vmatpush.msra.mxu0 %v2279_v24 }
0x1006   :  { %v2009_v26 = vsub.f32 %v1997_v59, %v2007_v15  ;;  %2140 = vmatpush.msra.mxu0 %v2278_v58  ;;  %v2050_v15 = vld [vmem:[#allocation4 + $0x18] sm:$0x2] }
0x1008   :  { %v2011_v13 = vmul.f32 %v2009_v26, %v2009_v26 }
0x100a   :  { %v2015_v16 = vsel %vm82_vm1, %v2011_v13, 0.0 }
0x100b   :  { %2016 = vadd.xlane.f32.xlu2 %v2015_v16 }
0x1076   :  { %v2014_v20 = vpop.xlane.xlu0 %2013 }
0x1077   :  { %v2018_v37 = vmul.f32 %v2014_v20, %v2768_v31  ;;  %v2051_v20 = vunpack.c.l.bf16 %v2050_v15 }
0x1079   :  { %v2020_v41 = vadd.f32 1e-05, %v2018_v37 }
0x107b   :  { %2469 = vrsqrt.f32 %v2020_v41  ;;  %vm2028_vm4 = vweird.f32 %v2020_v41 }
0x107e   :  { %v2017_v12 = vpop.xlane.xlu2 %2016 }
0x107f   :  { %v2019_v50 = vmul.f32 %v2017_v12, %v2768_v31  ;;  %v2096_v12 = vperm.slane %v50_v6, 1 }
0x1081   :  { %v2470_v51 = vpop.eup %2469  ;;  %v2021_v52 = vadd.f32 1e-05, %v2019_v50 }
0x1082   :  { %v2023_v53 = vmul.f32 %v2470_v51, %v2020_v41  ;;  %vm2029_vm8 = vweird.f32 %v2470_v51 }
0x1083   :  { %2471 = vrsqrt.f32 %v2021_v52  ;;  %vm2030_vm5 = vmor %vm2028_vm4, %vm2029_vm8  ;;  %vm2038_vm9 = vweird.f32 %v2021_v52 }
0x1084   :  { %v2024_v54 = vmul.f32 %v2470_v51, %v2023_v53 }
0x1086   :  { %v2025_v40 = vmul.f32 0.5, %v2024_v54 }
0x1088   :  { %v2026_v43 = vsub.f32 1.5, %v2025_v40 }
0x1089   :  { %v2472_v44 = vpop.eup %2471 }
0x108a   :  { %v2027_v45 = vmul.f32 %v2470_v51, %v2026_v43  ;;  %v2033_v46 = vmul.f32 %v2472_v44, %v2021_v52  ;;  %vm2039_vm7 = vweird.f32 %v2472_v44 }
0x108b   :  { %vm2040_vm10 = vmor %vm2038_vm9, %vm2039_vm7 }
0x108c   :  { %v2034_v21 = vmul.f32 %v2472_v44, %v2033_v46  ;;  %v2031_v48 = vsel %vm2030_vm5, %v2470_v51, %v2027_v45  ;;  %v2099_v51 = vperm.slane %v2051_v20, 2 }
0x108d   :  { %v2042_v49 = vmul.f32 %v2031_v48, %v2008_v8 }
0x108e   :  { %v2035_v27 = vmul.f32 0.5, %v2034_v21 }
0x108f   :  { %v2045_v39 = vmul.f32 %v2044_v47, %v2042_v49 }
0x1090   :  { %v2036_v56 = vsub.f32 1.5, %v2035_v27 }
0x1091   :  { %v2048_v57 = vadd.f32 %v2047_v18, %v2045_v39  ;;  %v2118_v39 = vperm.slane %v2051_v20, 3 }
0x1092   :  { %v2037_v60 = vmul.f32 %v2472_v44, %v2036_v56 }
0x1093   :  { %v2052_v19 = vsel %vm82_vm1, %v2048_v57, 0.0 }
0x1094   :  { %2053 = vadd.xlane.f32.xlu2 %v2052_v19  ;;  %v2041_v32 = vsel %vm2040_vm10, %v2472_v44, %v2037_v60 }
0x1095   :  { %v2043_v36 = vmul.f32 %v2041_v32, %v2009_v26 }
0x1097   :  { %v2046_v38 = vmul.f32 %v2044_v47, %v2043_v36 }
0x1099   :  { %v2049_v62 = vadd.f32 %v2047_v18, %v2046_v38 }
0x109b   :  { %v2055_v61 = vsel %vm82_vm1, %v2049_v62, 0.0 }
0x109c   :  { %2056 = vadd.xlane.f32.xlu1 %v2055_v61 }
0x1107   :  { %v2054_v28 = vpop.xlane.xlu2 %2053 }
0x1108   :  { %v2058_v33 = vmul.f32 %v2054_v28, %v2768_v31 }
0x110a   :  { %v2060_v63 = vsub.f32 %v2048_v57, %v2058_v33 }
0x110c   :  { %v2062_v0 = vmul.f32 %v2060_v63, %v2060_v63 }
0x110e   :  { %v2064_v2 = vsel %vm82_vm1, %v2062_v0, 0.0 }
0x110f   :  { %v2057_v4 = vpop.xlane.xlu1 %2056  ;;  %2065 = vadd.xlane.f32.xlu2 %v2064_v2 }
0x1110   :  { %v2059_v29 = vmul.f32 %v2057_v4, %v2768_v31 }
0x1112   :  { %v2061_v34 = vsub.f32 %v2049_v62, %v2059_v29 }
0x1114   :  { %v2063_v11 = vmul.f32 %v2061_v34, %v2061_v34 }
0x1116   :  { %v2067_v3 = vsel %vm82_vm1, %v2063_v11, 0.0 }
0x1117   :  { %2068 = vadd.xlane.f32.xlu2 %v2067_v3 }
0x1182   :  { %v2066_v1 = vpop.xlane.xlu2 %2065 }
0x1183   :  { %v2070_v23 = vmul.f32 %v2066_v1, %v2768_v31 }
0x1185   :  { %v2072_v59 = vadd.f32 1e-05, %v2070_v23 }
0x1187   :  { %2473 = vrsqrt.f32 %v2072_v59  ;;  %vm2080_vm12 = vweird.f32 %v2072_v59 }
0x118a   :  { %v2069_v25 = vpop.xlane.xlu2 %2068 }
0x118b   :  { %v2071_v7 = vmul.f32 %v2069_v25, %v2768_v31 }
0x118d   :  { %v2474_v8 = vpop.eup %2473  ;;  %v2073_v14 = vadd.f32 1e-05, %v2071_v7 }
0x118e   :  { %v2075_v35 = vmul.f32 %v2474_v8, %v2072_v59  ;;  %vm2081_vm11 = vweird.f32 %v2474_v8 }
0x118f   :  { %2475 = vrsqrt.f32 %v2073_v14  ;;  %vm2082_vm14 = vmor %vm2080_vm12, %vm2081_vm11  ;;  %vm2090_vm6 = vweird.f32 %v2073_v14 }
0x1190   :  { %v2076_v30 = vmul.f32 %v2474_v8, %v2075_v35 }
0x1192   :  { %v2077_v26 = vmul.f32 0.5, %v2076_v30 }
0x1194   :  { %v2078_v13 = vsub.f32 1.5, %v2077_v26 }
0x1195   :  { %v2476_v16 = vpop.eup %2475 }
0x1196   :  { %v2079_v37 = vmul.f32 %v2474_v8, %v2078_v13  ;;  %v2085_v41 = vmul.f32 %v2476_v16, %v2073_v14  ;;  %vm2091_vm0 = vweird.f32 %v2476_v16 }
0x1197   :  { %vm2092_vm13 = vmor %vm2090_vm6, %vm2091_vm0 }
0x1198   :  { %v2083_v50 = vsel %vm2082_vm14, %v2474_v8, %v2079_v37  ;;  %v2086_v31 = vmul.f32 %v2476_v16, %v2085_v41 }
0x1199   :  { %v2094_v52 = vmul.f32 %v2083_v50, %v2060_v63 }
0x119a   :  { %v2087_v53 = vmul.f32 0.5, %v2086_v31 }
0x119b   :  { %v2097_v54 = vmul.f32 %v2096_v12, %v2094_v52 }
0x119c   :  { %v2088_v55 = vsub.f32 1.5, %v2087_v53 }
0x119d   :  { %v2100_v40 = vadd.f32 %v2099_v51, %v2097_v54 }
0x119e   :  { %v2089_v42 = vmul.f32 %v2476_v16, %v2088_v55 }
0x119f   :  { %v2102_v43 = vmul.f32 0.5, %v2100_v40 }
0x11a0   :  { %v2093_v44 = vsel %vm2092_vm13, %v2476_v16, %v2089_v42 }
0x11a1   :  { %v2095_v45 = vmul.f32 %v2093_v44, %v2061_v34  ;;  %2477 = vtanh.f32 %v2102_v43 }
0x11a3   :  { %v2098_v46 = vmul.f32 %v2096_v12, %v2095_v45 }
0x11a5   :  { %v2101_v5 = vadd.f32 %v2099_v51, %v2098_v46 }
0x11a7   :  { %v2478_v6 = vpop.eup %2477  ;;  %v2103_v47 = vmul.f32 0.5, %v2101_v5 }
0x11a8   :  { %v2106_v21 = vmul.f32 0.5, %v2478_v6 }
0x11a9   :  { %2479 = vtanh.f32 %v2103_v47 }
0x11aa   :  { %v2108_v48 = vadd.f32 0.5, %v2106_v21 }
0x11ac   :  { %2222 = vmatmul.msk.f32.vlgmr.msra.gmra.mxu0 %vm82_vm1, %v2108_v48 }
0x11af   :  { %v2480_v49 = vpop.eup %2479 }
0x11b0   :  { %v2107_v18 = vmul.f32 0.5, %v2480_v49 }
0x11b2   :  { %v2109_v27 = vadd.f32 0.5, %v2107_v18 }
0x11b4   :  { %2223 = vmatmul.msk.f32.gmra.mxu0 %vm82_vm1, %v2109_v27 }
0x1229   :  { %v2142_v56 = vpop.f32.mrf.mxu0 }
0x122a   :  { %v2143_v57 = vadd.f32 %v2142_v56, %v2118_v39 }
0x122c   :  { %2148 = vst [vmem:[%s3036_s2] sm:$0xff] %v2143_v57 }
0x1231   :  { %v2145_v60 = vpop.f32.mrf.mxu0 }
0x1232   :  { %v2146_v19 = vadd.f32 %v2145_v60, %v2118_v39 }
0x1234   :  { %2149 = vst [vmem:[%s3036_s2 + $0x8] sm:$0xff] %v2146_v19 }
0x1235   :  { %2154 = vsyncpa [#allocation3], 1 }
0x1236   :  { %2155 = vsyncpa [#allocation5], 1 }

</bundles_post_ra>
